<compile_context>
chip_gen: v7x
topology: tpu7x:2x2x1
jax: 0.10.0
libtpu: 0.0.40
codegen_flags: <defaults>
</compile_context>

<pallas_src>
import math
from functools import partial

import jax
import jax.numpy as jnp
from jax.experimental import pallas as pl
from jax.experimental.pallas import tpu as pltpu


def encoder_block_kernel(heads, eps, ffn_chunk,
                         q_ref, k_ref, v_ref, kmask_ref,
                         wqb_ref, wkb_ref, wvb_ref,
                         wo_t_ref, bo_ref,
                         g1_ref, beta1_ref,
                         w1_t_ref, b1_ref, w2_t_ref, b2_ref,
                         g2_ref, beta2_ref,
                         out_ref,
                         ctx_ref):
    """One grid step == NB batch elements; whole sequence resident in VMEM."""
    NB, S, E = q_ref.shape
    H = heads
    D = E // H
    R = NB * S
    cdt = wqb_ref.dtype  # matmul compute dtype (bf16), f32 accumulation everywhere

    # Flatten batch into the matmul row dimension.
    q = q_ref[...].reshape(R, E)          # f32 (kept for the residual)
    k = k_ref[...].reshape(R, E)          # bf16 (host-cast)
    v = v_ref[...].reshape(R, E)          # bf16 (host-cast)

    # Q/K/V projections: single (R,E) x (E,E) matmuls with block-diagonal weights
    # (per-head shared (D,D) weight, 1/sqrt(D) folded into wqb on the host).
    qp = jnp.dot(q.astype(cdt), wqb_ref[...], preferred_element_type=jnp.float32)
    kp = jnp.dot(k, wkb_ref[...], preferred_element_type=jnp.float32)
    vp = jnp.dot(v, wvb_ref[...], preferred_element_type=jnp.float32)

    qp3 = qp.reshape(NB, S, E)
    vp3 = vp.reshape(NB, S, E)
    # Materialize K^T once per block for ALL heads: (NB, E, S). Each head's QK RHS is then
    # already (D, S) -> no implicit XLU transpose inside the per-head matmul.
    kpt = jnp.swapaxes(kp.reshape(NB, S, E), 1, 2)

    # Additive key-padding mask (0 / -1e20), f32, hoisted out of the head loop.
    addm = kmask_ref[...]                 # (NB, 1, S)

    # Per-head attention. Context goes straight into the VMEM scratch at static offsets
    # (no concatenate; each iteration is store-terminated so intermediates die early).
    for h in range(H):
        lo = h * D
        qh = qp3[:, :, lo:lo + D].astype(cdt)          # (NB, S, D)
        kth = kpt[:, lo:lo + D, :].astype(cdt)         # (NB, D, S) - sublane slice
        vh = vp3[:, :, lo:lo + D].astype(cdt)          # (NB, S, D)

        energy = jnp.einsum('nqd,ndk->nqk', qh, kth,
                            preferred_element_type=jnp.float32)   # (NB, S, S)
        energy = energy + addm                          # f32 mask add

        m = jnp.max(energy, axis=-1, keepdims=True)
        p = jnp.exp(energy - m)
        denom = jnp.sum(p, axis=-1, keepdims=True)
        # PV matmul first, then scale by 1/denom on the (NB,S,D) context (S/D x fewer muls).
        ch = jnp.einsum('nqk,nkd->nqd', p.astype(cdt), vh,
                        preferred_element_type=jnp.float32)       # (NB, S, D)
        ch = ch * pl.reciprocal(denom, approx=True)
        ctx_ref[:, lo:lo + D] = ch.reshape(R, D)

    ctx = ctx_ref[...].astype(cdt)                      # (R, E), head-major channels

    # Output projection (weight pre-transposed on the host).
    attn_out = jnp.dot(ctx, wo_t_ref[...],
                       preferred_element_type=jnp.float32) + bo_ref[...]

    # Residual + LayerNorm 1 (dropout == identity in eval mode).
    x = attn_out + q
    mu = jnp.mean(x, axis=-1, keepdims=True)
    xc = x - mu
    var = jnp.mean(xc * xc, axis=-1, keepdims=True)
    x = xc * jax.lax.rsqrt(var + eps) * g1_ref[...] + beta1_ref[...]

    # Feed-forward: Linear -> ReLU -> Linear, tiled over the hidden (4E) dimension so the
    # f32 intermediate is (R, ffn_chunk) instead of (R, 4E).
    x_b = x.astype(cdt)
    hidden = w1_t_ref.shape[1]
    f = None
    for c0 in range(0, hidden, ffn_chunk):
        c1 = c0 + ffn_chunk
        hc = jnp.dot(x_b, w1_t_ref[:, c0:c1],
                     preferred_element_type=jnp.float32) + b1_ref[:, c0:c1]
        hc = jnp.maximum(hc, 0.0)
        fc = jnp.dot(hc.astype(cdt), w2_t_ref[c0:c1, :],
                     preferred_element_type=jnp.float32)
        f = fc if f is None else f + fc
    f = f + b2_ref[...]

    # Residual + LayerNorm 2 (dropout == identity in eval mode).
    y = f + x
    mu2 = jnp.mean(y, axis=-1, keepdims=True)
    yc = y - mu2
    var2 = jnp.mean(yc * yc, axis=-1, keepdims=True)
    y = yc * jax.lax.rsqrt(var2 + eps) * g2_ref[...] + beta2_ref[...]

    out_ref[...] = y.reshape(NB, S, E).astype(out_ref.dtype)


def transformer_encoder_block(value, key_, query, mask, params, heads,
                              *, batch_block=None, ffn_block=1024,
                              matmul_dtype=jnp.bfloat16):
    N, S, E = query.shape
    assert E % heads == 0, "Embed size must be divisible by heads"
    D = E // heads
    hidden = params['w1'].shape[0]

    if batch_block is None:
        # At least 2 grid steps when possible: overlaps q/k/v/out DMA with compute and lets
        # v7x's second TensorCore pick up half the batch (neutral but harmless on v5e/v6e).
        NB = N // 2 if (N >= 2 and N % 2 == 0) else N
    else:
        NB = batch_block
    assert N % NB == 0

    ffn_chunk = min(ffn_block, hidden)
    assert hidden % ffn_chunk == 0

    # ---- host-side weight preparation (done once, outside the kernel) ----
    eye_h = jnp.eye(heads, dtype=jnp.float32)
    # Block-diagonal per-head projections; 1/sqrt(D) folded into the query weight.
    # (Kept block-diagonal: fills the wide MXU contraction on v6e/v7x; see perf notes for v5e.)
    wq_big = jnp.kron(eye_h, params['wq'].T / math.sqrt(D)).astype(matmul_dtype)
    wk_big = jnp.kron(eye_h, params['wk'].T).astype(matmul_dtype)
    wv_big = jnp.kron(eye_h, params['wv'].T).astype(matmul_dtype)
    wo_t = params['wo'].T.astype(matmul_dtype)     # (E, E)
    w1_t = params['w1'].T.astype(matmul_dtype)     # (E, 4E)
    w2_t = params['w2'].T.astype(matmul_dtype)     # (4E, E)

    # Key-padding additive mask: (N,1,S) f32 vector instead of an (N,1,S,S) S^2 tensor.
    # TODO(synk): general query-dependent (N,H,S,S) masks would need the full S^2 mask path.
    key_row = mask[:, 0, 0, :]                                   # (N, S)
    addkey = jnp.where(key_row == 0, jnp.float32(-1e20),
                       jnp.float32(0.0))[:, None, :]             # (N, 1, S) f32

    # key/value are only consumed by bf16 matmuls -> halve their DMA/VMEM. query stays f32.
    key_b = key_.astype(matmul_dtype)
    value_b = value.astype(matmul_dtype)

    kernel = partial(encoder_block_kernel, heads, 1e-5, ffn_chunk)

    weights = [wq_big, wk_big, wv_big,
               wo_t, params['bo'],
               params['g1'], params['beta1'],
               w1_t, params['b1'], w2_t, params['b2'],
               params['g2'], params['beta2']]

    def wspec(arr):
        zeros = (0,) * arr.ndim
        # Constant block (index_map never changes) -> single pipeline buffer.
        return pl.BlockSpec(arr.shape, lambda n, _z=zeros: _z,
                            pipeline_mode=pl.Buffered(1))

    in_specs = [
        pl.BlockSpec((NB, S, E), lambda n: (n, 0, 0)),      # query  (f32)
        pl.BlockSpec((NB, S, E), lambda n: (n, 0, 0)),      # key    (bf16)
        pl.BlockSpec((NB, S, E), lambda n: (n, 0, 0)),      # value  (bf16)
        pl.BlockSpec((NB, 1, S), lambda n: (n, 0, 0)),      # additive key mask (f32)
    ] + [wspec(w) for w in weights]

    # Per-generation VMEM budget (v5e/v6e: 128 MiB physical, v7x: 64 MiB) with headroom.
    try:
        vmem_phys = pltpu.get_tpu_info().vmem_capacity_bytes
    except Exception:
        vmem_phys = 64 * 1024 * 1024
    vmem_limit = int(min(vmem_phys * 3 // 4, 100 * 1024 * 1024))

    return pl.pallas_call(
        kernel,
        out_shape=jax.ShapeDtypeStruct((N, S, E), jnp.float32),
        grid_spec=pltpu.PrefetchScalarGridSpec(
            num_scalar_prefetch=0,
            grid=(N // NB,),
            in_specs=in_specs,
            out_specs=pl.BlockSpec((NB, S, E), lambda n: (n, 0, 0)),
            scratch_shapes=[pltpu.VMEM((NB * S, E), jnp.float32)],
        ),
        compiler_params=pltpu.CompilerParams(
            dimension_semantics=("parallel",),
            vmem_limit_bytes=vmem_limit,
        ),
    )(query, key_b, value_b, addkey, *weights)


def reference(value, key_, query, mask, params, heads):
    """Pure-JAX (f32) mirror of the PyTorch forward (eval mode)."""
    N, S, E = query.shape
    D = E // heads

    def proj(x, W):
        return jnp.einsum('nshd,ed->nshe', x.reshape(N, S, heads, D), W)

    qp = proj(query, params['wq'])
    kp = proj(key_, params['wk'])
    vp = proj(value, params['wv'])
    energy = jnp.einsum('nqhd,nkhd->nhqk', qp, kp) / math.sqrt(D)
    energy = jnp.where(mask == 0, -1e20, energy)
    attn = jax.nn.softmax(energy, axis=3)
    out = jnp.einsum('nhql,nlhd->nqhd', attn, vp).reshape(N, S, E)
    out = out @ params['wo'].T + params['bo'][0]

    def ln(x, g, b):
        mu = x.mean(-1, keepdims=True)
        var = ((x - mu) ** 2).mean(-1, keepdims=True)
        return (x - mu) / jnp.sqrt(var + 1e-5) * g[0] + b[0]

    x = ln(out + query, params['g1'], params['beta1'])
    h = jnp.maximum(x @ params['w1'].T + params['b1'][0], 0.0)
    f = h @ params['w2'].T + params['b2'][0]
    return ln(f + x, params['g2'], params['beta2'])


if __name__ == "__main__":
    N, S, E = 2, 8, 32
    heads = 4
    forward_expansion = 4
    D = E // heads
    hidden = forward_expansion * E

    root = jax.random.PRNGKey(0)
    keys = jax.random.split(root, 12)

    params = {
        'wv': 0.05 * jax.random.normal(keys[0], (D, D), jnp.float32),
        'wk': 0.05 * jax.random.normal(keys[1], (D, D), jnp.float32),
        'wq': 0.05 * jax.random.normal(keys[2], (D, D), jnp.float32),
        'wo': 0.05 * jax.random.normal(keys[3], (E, E), jnp.float32),
        'bo': 0.05 * jax.random.normal(keys[4], (1, E), jnp.float32),
        'g1': jnp.ones((1, E), jnp.float32),
        'beta1': jnp.zeros((1, E), jnp.float32),
        'g2': jnp.ones((1, E), jnp.float32),
        'beta2': jnp.zeros((1, E), jnp.float32),
        'w1': 0.05 * jax.random.normal(keys[5], (hidden, E), jnp.float32),
        'b1': 0.05 * jax.random.normal(keys[6], (1, hidden), jnp.float32),
        'w2': 0.05 * jax.random.normal(keys[7], (E, hidden), jnp.float32),
        'b2': 0.05 * jax.random.normal(keys[8], (1, E), jnp.float32),
    }

    value = jax.random.normal(keys[9], (N, S, E), jnp.float32)
    key_ = jax.random.normal(keys[10], (N, S, E), jnp.float32)
    query = jax.random.normal(keys[11], (N, S, E), jnp.float32)

    # padding-style mask: batch 0 attends all 8 keys, batch 1 only the first 6
    lens = jnp.array([S, S - 2])
    key_valid = jnp.arange(S)[None, :] < lens[:, None]                  # (N, S)
    mask = jnp.broadcast_to(key_valid[:, None, None, :], (N, 1, S, S)).astype(jnp.int32)

    out = transformer_encoder_block(value, key_, query, mask, params, heads)
    out = jax.block_until_ready(out)

    ref = reference(value, key_, query, mask, params, heads)
    assert out.shape == (N, S, E)
    err = float(jnp.max(jnp.abs(out - ref)))
    # bf16 MXU inputs (f32 accumulation) + approx reciprocal -> looser tolerance than pure-f32
    assert err < 2e-2, f"mismatch vs pure-JAX reference: max abs err {err}"

    print("KERNEL_OK")
</pallas_src>

<mosaic_0001>
module attributes {stable_mosaic.version = 11 : i64} {
  func.func @encoder_block_kernel(%arg0: i32, %arg1: memref<1x8x32xf32, #tpu.memory_space<vmem>>, %arg2: memref<1x8x32xbf16, #tpu.memory_space<vmem>>, %arg3: memref<1x8x32xbf16, #tpu.memory_space<vmem>>, %arg4: memref<1x1x8xf32, #tpu.memory_space<vmem>>, %arg5: memref<32x32xbf16, #tpu.memory_space<vmem>>, %arg6: memref<32x32xbf16, #tpu.memory_space<vmem>>, %arg7: memref<32x32xbf16, #tpu.memory_space<vmem>>, %arg8: memref<32x32xbf16, #tpu.memory_space<vmem>>, %arg9: memref<1x32xf32, #tpu.memory_space<vmem>>, %arg10: memref<1x32xf32, #tpu.memory_space<vmem>>, %arg11: memref<1x32xf32, #tpu.memory_space<vmem>>, %arg12: memref<32x128xbf16, #tpu.memory_space<vmem>>, %arg13: memref<1x128xf32, #tpu.memory_space<vmem>>, %arg14: memref<128x32xbf16, #tpu.memory_space<vmem>>, %arg15: memref<1x32xf32, #tpu.memory_space<vmem>>, %arg16: memref<1x32xf32, #tpu.memory_space<vmem>>, %arg17: memref<1x32xf32, #tpu.memory_space<vmem>>, %arg18: memref<1x8x32xf32, #tpu.memory_space<vmem>>, %arg19: memref<8x32xf32, #tpu.memory_space<vmem>>) attributes {dimension_semantics = [#tpu.dimension_semantics<parallel>], iteration_bounds = array<i64: 2>, scalar_prefetch = 0 : i64, scratch_operands = 1 : i64, tpu.core_type = #tpu.core_type<tc>, window_params = [{transform_indices = @transform_0, window_bounds = array<i64: 1, 8, 32>}, {transform_indices = @transform_1, window_bounds = array<i64: 1, 8, 32>}, {transform_indices = @transform_2, window_bounds = array<i64: 1, 8, 32>}, {transform_indices = @transform_3, window_bounds = array<i64: 1, 1, 8>}, {pipeline_mode = #tpu.pipeline_mode<synchronous>, transform_indices = @transform_4, window_bounds = array<i64: 32, 32>}, {pipeline_mode = #tpu.pipeline_mode<synchronous>, transform_indices = @transform_5, window_bounds = array<i64: 32, 32>}, {pipeline_mode = #tpu.pipeline_mode<synchronous>, transform_indices = @transform_6, window_bounds = array<i64: 32, 32>}, {pipeline_mode = #tpu.pipeline_mode<synchronous>, transform_indices = @transform_7, window_bounds = array<i64: 32, 32>}, {pipeline_mode = #tpu.pipeline_mode<synchronous>, transform_indices = @transform_8, window_bounds = array<i64: 1, 32>}, {pipeline_mode = #tpu.pipeline_mode<synchronous>, transform_indices = @transform_9, window_bounds = array<i64: 1, 32>}, {pipeline_mode = #tpu.pipeline_mode<synchronous>, transform_indices = @transform_10, window_bounds = array<i64: 1, 32>}, {pipeline_mode = #tpu.pipeline_mode<synchronous>, transform_indices = @transform_11, window_bounds = array<i64: 32, 128>}, {pipeline_mode = #tpu.pipeline_mode<synchronous>, transform_indices = @transform_12, window_bounds = array<i64: 1, 128>}, {pipeline_mode = #tpu.pipeline_mode<synchronous>, transform_indices = @transform_13, window_bounds = array<i64: 128, 32>}, {pipeline_mode = #tpu.pipeline_mode<synchronous>, transform_indices = @transform_14, window_bounds = array<i64: 1, 32>}, {pipeline_mode = #tpu.pipeline_mode<synchronous>, transform_indices = @transform_15, window_bounds = array<i64: 1, 32>}, {pipeline_mode = #tpu.pipeline_mode<synchronous>, transform_indices = @transform_16, window_bounds = array<i64: 1, 32>}, {transform_indices = @transform_17, window_bounds = array<i64: 1, 8, 32>}]} {
    %c0 = arith.constant 0 : index
    %c0_0 = arith.constant 0 : index
    %c0_1 = arith.constant 0 : index
    %0 = vector.load %arg1[%c0, %c0_0, %c0_1] : memref<1x8x32xf32, #tpu.memory_space<vmem>>, vector<1x8x32xf32>
    %1 = vector.shape_cast %0 : vector<1x8x32xf32> to vector<8x32xf32>
    %c0_2 = arith.constant 0 : index
    %c0_3 = arith.constant 0 : index
    %c0_4 = arith.constant 0 : index
    %2 = vector.load %arg2[%c0_2, %c0_3, %c0_4] : memref<1x8x32xbf16, #tpu.memory_space<vmem>>, vector<1x8x32xbf16>
    %3 = vector.shape_cast %2 : vector<1x8x32xbf16> to vector<8x32xbf16>
    %c0_5 = arith.constant 0 : index
    %c0_6 = arith.constant 0 : index
    %c0_7 = arith.constant 0 : index
    %4 = vector.load %arg3[%c0_5, %c0_6, %c0_7] : memref<1x8x32xbf16, #tpu.memory_space<vmem>>, vector<1x8x32xbf16>
    %5 = vector.shape_cast %4 : vector<1x8x32xbf16> to vector<8x32xbf16>
    %6 = arith.truncf %1 : vector<8x32xf32> to vector<8x32xbf16>
    %c0_8 = arith.constant 0 : index
    %c0_9 = arith.constant 0 : index
    %7 = vector.load %arg5[%c0_8, %c0_9] : memref<32x32xbf16, #tpu.memory_space<vmem>>, vector<32x32xbf16>
    %cst = arith.constant dense<0.000000e+00> : vector<8x32xf32>
    %8 = tpu.matmul %6, %7, %cst {dimension_numbers = #tpu.dot_dimension_numbers<[1], [0], [0], [1], [0, 0, 1, 1], [], []>} : vector<8x32xbf16>, vector<32x32xbf16>, vector<8x32xf32> -> vector<8x32xf32>
    %c0_10 = arith.constant 0 : index
    %c0_11 = arith.constant 0 : index
    %9 = vector.load %arg6[%c0_10, %c0_11] : memref<32x32xbf16, #tpu.memory_space<vmem>>, vector<32x32xbf16>
    %cst_12 = arith.constant dense<0.000000e+00> : vector<8x32xf32>
    %10 = tpu.matmul %3, %9, %cst_12 {dimension_numbers = #tpu.dot_dimension_numbers<[1], [0], [0], [1], [0, 0, 1, 1], [], []>} : vector<8x32xbf16>, vector<32x32xbf16>, vector<8x32xf32> -> vector<8x32xf32>
    %c0_13 = arith.constant 0 : index
    %c0_14 = arith.constant 0 : index
    %11 = vector.load %arg7[%c0_13, %c0_14] : memref<32x32xbf16, #tpu.memory_space<vmem>>, vector<32x32xbf16>
    %cst_15 = arith.constant dense<0.000000e+00> : vector<8x32xf32>
    %12 = tpu.matmul %5, %11, %cst_15 {dimension_numbers = #tpu.dot_dimension_numbers<[1], [0], [0], [1], [0, 0, 1, 1], [], []>} : vector<8x32xbf16>, vector<32x32xbf16>, vector<8x32xf32> -> vector<8x32xf32>
    %13 = vector.shape_cast %8 : vector<8x32xf32> to vector<1x8x32xf32>
    %14 = vector.shape_cast %12 : vector<8x32xf32> to vector<1x8x32xf32>
    %15 = vector.shape_cast %10 : vector<8x32xf32> to vector<1x8x32xf32>
    %16 = tpu.transpose %15, [0, 2, 1] : vector<1x8x32xf32> -> vector<1x32x8xf32>
    %c0_16 = arith.constant 0 : index
    %c0_17 = arith.constant 0 : index
    %c0_18 = arith.constant 0 : index
    %17 = vector.load %arg4[%c0_16, %c0_17, %c0_18] : memref<1x1x8xf32, #tpu.memory_space<vmem>>, vector<1x1x8xf32>
    %18 = vector.extract_strided_slice %13 {offsets = [0, 0, 0], sizes = [1, 8, 8], strides = [1, 1, 1]} : vector<1x8x32xf32> to vector<1x8x8xf32>
    %19 = arith.truncf %18 : vector<1x8x8xf32> to vector<1x8x8xbf16>
    %20 = vector.extract_strided_slice %16 {offsets = [0, 0, 0], sizes = [1, 8, 8], strides = [1, 1, 1]} : vector<1x32x8xf32> to vector<1x8x8xf32>
    %21 = arith.truncf %20 : vector<1x8x8xf32> to vector<1x8x8xbf16>
    %22 = vector.extract_strided_slice %14 {offsets = [0, 0, 0], sizes = [1, 8, 8], strides = [1, 1, 1]} : vector<1x8x32xf32> to vector<1x8x8xf32>
    %23 = arith.truncf %22 : vector<1x8x8xf32> to vector<1x8x8xbf16>
    "tpu.trace_start"() <{level = 10 : i32, message = "nqd,ndk->nqk"}> : () -> ()
    %cst_19 = arith.constant dense<0.000000e+00> : vector<1x8x8xf32>
    %24 = tpu.matmul %19, %21, %cst_19 {dimension_numbers = #tpu.dot_dimension_numbers<[2], [1], [1], [2], [0, 0, 0, 1, 1, 2], [0], [0]>} : vector<1x8x8xbf16>, vector<1x8x8xbf16>, vector<1x8x8xf32> -> vector<1x8x8xf32>
    "tpu.trace_stop"() : () -> ()
    %25 = vector.broadcast %17 : vector<1x1x8xf32> to vector<1x8x8xf32>
    %26 = arith.addf %24, %25 : vector<1x8x8xf32>
    %cst_20 = arith.constant dense<0xFF800000> : vector<1x8xf32>
    %27 = vector.multi_reduction <maximumf>, %26, %cst_20 [2] : vector<1x8x8xf32> to vector<1x8xf32>
    %28 = vector.shape_cast %27 : vector<1x8xf32> to vector<1x8x1xf32>
    %29 = vector.broadcast %28 : vector<1x8x1xf32> to vector<1x8x8xf32>
    %30 = arith.subf %26, %29 : vector<1x8x8xf32>
    %31 = math.exp %30 : vector<1x8x8xf32>
    %cst_21 = arith.constant dense<0.000000e+00> : vector<1x8xf32>
    %32 = vector.multi_reduction <add>, %31, %cst_21 [2] : vector<1x8x8xf32> to vector<1x8xf32>
    %33 = vector.shape_cast %32 : vector<1x8xf32> to vector<1x8x1xf32>
    %34 = arith.truncf %31 : vector<1x8x8xf32> to vector<1x8x8xbf16>
    "tpu.trace_start"() <{level = 10 : i32, message = "nqk,nkd->nqd"}> : () -> ()
    %cst_22 = arith.constant dense<0.000000e+00> : vector<1x8x8xf32>
    %35 = tpu.matmul %34, %23, %cst_22 {dimension_numbers = #tpu.dot_dimension_numbers<[2], [1], [1], [2], [0, 0, 0, 1, 1, 2], [0], [0]>} : vector<1x8x8xbf16>, vector<1x8x8xbf16>, vector<1x8x8xf32> -> vector<1x8x8xf32>
    "tpu.trace_stop"() : () -> ()
    %36 = tpu.reciprocal %33 {approx = true} : vector<1x8x1xf32> -> vector<1x8x1xf32>
    %37 = vector.broadcast %36 : vector<1x8x1xf32> to vector<1x8x8xf32>
    %38 = arith.mulf %35, %37 : vector<1x8x8xf32>
    %39 = vector.shape_cast %38 : vector<1x8x8xf32> to vector<8x8xf32>
    %c0_23 = arith.constant 0 : index
    %c0_24 = arith.constant 0 : index
    %40 = vector.load %arg19[%c0_23, %c0_24] : memref<8x32xf32, #tpu.memory_space<vmem>>, vector<8x8xf32>
    tpu.vector_store %arg19[%c0_23, %c0_24], %39 {strides = array<i32>} : memref<8x32xf32, #tpu.memory_space<vmem>>, vector<8x8xf32>,
    %41 = vector.extract_strided_slice %13 {offsets = [0, 0, 8], sizes = [1, 8, 8], strides = [1, 1, 1]} : vector<1x8x32xf32> to vector<1x8x8xf32>
    %42 = arith.truncf %41 : vector<1x8x8xf32> to vector<1x8x8xbf16>
    %43 = vector.extract_strided_slice %16 {offsets = [0, 8, 0], sizes = [1, 8, 8], strides = [1, 1, 1]} : vector<1x32x8xf32> to vector<1x8x8xf32>
    %44 = arith.truncf %43 : vector<1x8x8xf32> to vector<1x8x8xbf16>
    %45 = vector.extract_strided_slice %14 {offsets = [0, 0, 8], sizes = [1, 8, 8], strides = [1, 1, 1]} : vector<1x8x32xf32> to vector<1x8x8xf32>
    %46 = arith.truncf %45 : vector<1x8x8xf32> to vector<1x8x8xbf16>
    "tpu.trace_start"() <{level = 10 : i32, message = "nqd,ndk->nqk"}> : () -> ()
    %cst_25 = arith.constant dense<0.000000e+00> : vector<1x8x8xf32>
    %47 = tpu.matmul %42, %44, %cst_25 {dimension_numbers = #tpu.dot_dimension_numbers<[2], [1], [1], [2], [0, 0, 0, 1, 1, 2], [0], [0]>} : vector<1x8x8xbf16>, vector<1x8x8xbf16>, vector<1x8x8xf32> -> vector<1x8x8xf32>
    "tpu.trace_stop"() : () -> ()
    %48 = vector.broadcast %17 : vector<1x1x8xf32> to vector<1x8x8xf32>
    %49 = arith.addf %47, %48 : vector<1x8x8xf32>
    %cst_26 = arith.constant dense<0xFF800000> : vector<1x8xf32>
    %50 = vector.multi_reduction <maximumf>, %49, %cst_26 [2] : vector<1x8x8xf32> to vector<1x8xf32>
    %51 = vector.shape_cast %50 : vector<1x8xf32> to vector<1x8x1xf32>
    %52 = vector.broadcast %51 : vector<1x8x1xf32> to vector<1x8x8xf32>
    %53 = arith.subf %49, %52 : vector<1x8x8xf32>
    %54 = math.exp %53 : vector<1x8x8xf32>
    %cst_27 = arith.constant dense<0.000000e+00> : vector<1x8xf32>
    %55 = vector.multi_reduction <add>, %54, %cst_27 [2] : vector<1x8x8xf32> to vector<1x8xf32>
    %56 = vector.shape_cast %55 : vector<1x8xf32> to vector<1x8x1xf32>
    %57 = arith.truncf %54 : vector<1x8x8xf32> to vector<1x8x8xbf16>
    "tpu.trace_start"() <{level = 10 : i32, message = "nqk,nkd->nqd"}> : () -> ()
    %cst_28 = arith.constant dense<0.000000e+00> : vector<1x8x8xf32>
    %58 = tpu.matmul %57, %46, %cst_28 {dimension_numbers = #tpu.dot_dimension_numbers<[2], [1], [1], [2], [0, 0, 0, 1, 1, 2], [0], [0]>} : vector<1x8x8xbf16>, vector<1x8x8xbf16>, vector<1x8x8xf32> -> vector<1x8x8xf32>
    "tpu.trace_stop"() : () -> ()
    %59 = tpu.reciprocal %56 {approx = true} : vector<1x8x1xf32> -> vector<1x8x1xf32>
    %60 = vector.broadcast %59 : vector<1x8x1xf32> to vector<1x8x8xf32>
    %61 = arith.mulf %58, %60 : vector<1x8x8xf32>
    %62 = vector.shape_cast %61 : vector<1x8x8xf32> to vector<8x8xf32>
    %c0_29 = arith.constant 0 : index
    %c8 = arith.constant 8 : index
    %63 = vector.load %arg19[%c0_29, %c8] : memref<8x32xf32, #tpu.memory_space<vmem>>, vector<8x8xf32>
    tpu.vector_store %arg19[%c0_29, %c8], %62 {strides = array<i32>} : memref<8x32xf32, #tpu.memory_space<vmem>>, vector<8x8xf32>,
    %64 = vector.extract_strided_slice %13 {offsets = [0, 0, 16], sizes = [1, 8, 8], strides = [1, 1, 1]} : vector<1x8x32xf32> to vector<1x8x8xf32>
    %65 = arith.truncf %64 : vector<1x8x8xf32> to vector<1x8x8xbf16>
    %66 = vector.extract_strided_slice %16 {offsets = [0, 16, 0], sizes = [1, 8, 8], strides = [1, 1, 1]} : vector<1x32x8xf32> to vector<1x8x8xf32>
    %67 = arith.truncf %66 : vector<1x8x8xf32> to vector<1x8x8xbf16>
    %68 = vector.extract_strided_slice %14 {offsets = [0, 0, 16], sizes = [1, 8, 8], strides = [1, 1, 1]} : vector<1x8x32xf32> to vector<1x8x8xf32>
    %69 = arith.truncf %68 : vector<1x8x8xf32> to vector<1x8x8xbf16>
    "tpu.trace_start"() <{level = 10 : i32, message = "nqd,ndk->nqk"}> : () -> ()
    %cst_30 = arith.constant dense<0.000000e+00> : vector<1x8x8xf32>
    %70 = tpu.matmul %65, %67, %cst_30 {dimension_numbers = #tpu.dot_dimension_numbers<[2], [1], [1], [2], [0, 0, 0, 1, 1, 2], [0], [0]>} : vector<1x8x8xbf16>, vector<1x8x8xbf16>, vector<1x8x8xf32> -> vector<1x8x8xf32>
    "tpu.trace_stop"() : () -> ()
    %71 = vector.broadcast %17 : vector<1x1x8xf32> to vector<1x8x8xf32>
    %72 = arith.addf %70, %71 : vector<1x8x8xf32>
    %cst_31 = arith.constant dense<0xFF800000> : vector<1x8xf32>
    %73 = vector.multi_reduction <maximumf>, %72, %cst_31 [2] : vector<1x8x8xf32> to vector<1x8xf32>
    %74 = vector.shape_cast %73 : vector<1x8xf32> to vector<1x8x1xf32>
    %75 = vector.broadcast %74 : vector<1x8x1xf32> to vector<1x8x8xf32>
    %76 = arith.subf %72, %75 : vector<1x8x8xf32>
    %77 = math.exp %76 : vector<1x8x8xf32>
    %cst_32 = arith.constant dense<0.000000e+00> : vector<1x8xf32>
    %78 = vector.multi_reduction <add>, %77, %cst_32 [2] : vector<1x8x8xf32> to vector<1x8xf32>
    %79 = vector.shape_cast %78 : vector<1x8xf32> to vector<1x8x1xf32>
    %80 = arith.truncf %77 : vector<1x8x8xf32> to vector<1x8x8xbf16>
    "tpu.trace_start"() <{level = 10 : i32, message = "nqk,nkd->nqd"}> : () -> ()
    %cst_33 = arith.constant dense<0.000000e+00> : vector<1x8x8xf32>
    %81 = tpu.matmul %80, %69, %cst_33 {dimension_numbers = #tpu.dot_dimension_numbers<[2], [1], [1], [2], [0, 0, 0, 1, 1, 2], [0], [0]>} : vector<1x8x8xbf16>, vector<1x8x8xbf16>, vector<1x8x8xf32> -> vector<1x8x8xf32>
    "tpu.trace_stop"() : () -> ()
    %82 = tpu.reciprocal %79 {approx = true} : vector<1x8x1xf32> -> vector<1x8x1xf32>
    %83 = vector.broadcast %82 : vector<1x8x1xf32> to vector<1x8x8xf32>
    %84 = arith.mulf %81, %83 : vector<1x8x8xf32>
    %85 = vector.shape_cast %84 : vector<1x8x8xf32> to vector<8x8xf32>
    %c0_34 = arith.constant 0 : index
    %c16 = arith.constant 16 : index
    %86 = vector.load %arg19[%c0_34, %c16] : memref<8x32xf32, #tpu.memory_space<vmem>>, vector<8x8xf32>
    tpu.vector_store %arg19[%c0_34, %c16], %85 {strides = array<i32>} : memref<8x32xf32, #tpu.memory_space<vmem>>, vector<8x8xf32>,
    %87 = vector.extract_strided_slice %13 {offsets = [0, 0, 24], sizes = [1, 8, 8], strides = [1, 1, 1]} : vector<1x8x32xf32> to vector<1x8x8xf32>
    %88 = arith.truncf %87 : vector<1x8x8xf32> to vector<1x8x8xbf16>
    %89 = vector.extract_strided_slice %16 {offsets = [0, 24, 0], sizes = [1, 8, 8], strides = [1, 1, 1]} : vector<1x32x8xf32> to vector<1x8x8xf32>
    %90 = arith.truncf %89 : vector<1x8x8xf32> to vector<1x8x8xbf16>
    %91 = vector.extract_strided_slice %14 {offsets = [0, 0, 24], sizes = [1, 8, 8], strides = [1, 1, 1]} : vector<1x8x32xf32> to vector<1x8x8xf32>
    %92 = arith.truncf %91 : vector<1x8x8xf32> to vector<1x8x8xbf16>
    "tpu.trace_start"() <{level = 10 : i32, message = "nqd,ndk->nqk"}> : () -> ()
    %cst_35 = arith.constant dense<0.000000e+00> : vector<1x8x8xf32>
    %93 = tpu.matmul %88, %90, %cst_35 {dimension_numbers = #tpu.dot_dimension_numbers<[2], [1], [1], [2], [0, 0, 0, 1, 1, 2], [0], [0]>} : vector<1x8x8xbf16>, vector<1x8x8xbf16>, vector<1x8x8xf32> -> vector<1x8x8xf32>
    "tpu.trace_stop"() : () -> ()
    %94 = vector.broadcast %17 : vector<1x1x8xf32> to vector<1x8x8xf32>
    %95 = arith.addf %93, %94 : vector<1x8x8xf32>
    %cst_36 = arith.constant dense<0xFF800000> : vector<1x8xf32>
    %96 = vector.multi_reduction <maximumf>, %95, %cst_36 [2] : vector<1x8x8xf32> to vector<1x8xf32>
    %97 = vector.shape_cast %96 : vector<1x8xf32> to vector<1x8x1xf32>
    %98 = vector.broadcast %97 : vector<1x8x1xf32> to vector<1x8x8xf32>
    %99 = arith.subf %95, %98 : vector<1x8x8xf32>
    %100 = math.exp %99 : vector<1x8x8xf32>
    %cst_37 = arith.constant dense<0.000000e+00> : vector<1x8xf32>
    %101 = vector.multi_reduction <add>, %100, %cst_37 [2] : vector<1x8x8xf32> to vector<1x8xf32>
    %102 = vector.shape_cast %101 : vector<1x8xf32> to vector<1x8x1xf32>
    %103 = arith.truncf %100 : vector<1x8x8xf32> to vector<1x8x8xbf16>
    "tpu.trace_start"() <{level = 10 : i32, message = "nqk,nkd->nqd"}> : () -> ()
    %cst_38 = arith.constant dense<0.000000e+00> : vector<1x8x8xf32>
    %104 = tpu.matmul %103, %92, %cst_38 {dimension_numbers = #tpu.dot_dimension_numbers<[2], [1], [1], [2], [0, 0, 0, 1, 1, 2], [0], [0]>} : vector<1x8x8xbf16>, vector<1x8x8xbf16>, vector<1x8x8xf32> -> vector<1x8x8xf32>
    "tpu.trace_stop"() : () -> ()
    %105 = tpu.reciprocal %102 {approx = true} : vector<1x8x1xf32> -> vector<1x8x1xf32>
    %106 = vector.broadcast %105 : vector<1x8x1xf32> to vector<1x8x8xf32>
    %107 = arith.mulf %104, %106 : vector<1x8x8xf32>
    %108 = vector.shape_cast %107 : vector<1x8x8xf32> to vector<8x8xf32>
    %c0_39 = arith.constant 0 : index
    %c24 = arith.constant 24 : index
    %109 = vector.load %arg19[%c0_39, %c24] : memref<8x32xf32, #tpu.memory_space<vmem>>, vector<8x8xf32>
    tpu.vector_store %arg19[%c0_39, %c24], %108 {strides = array<i32>} : memref<8x32xf32, #tpu.memory_space<vmem>>, vector<8x8xf32>,
    %c0_40 = arith.constant 0 : index
    %c0_41 = arith.constant 0 : index
    %110 = vector.load %arg19[%c0_40, %c0_41] : memref<8x32xf32, #tpu.memory_space<vmem>>, vector<8x32xf32>
    %111 = arith.truncf %110 : vector<8x32xf32> to vector<8x32xbf16>
    %c0_42 = arith.constant 0 : index
    %c0_43 = arith.constant 0 : index
    %112 = vector.load %arg8[%c0_42, %c0_43] : memref<32x32xbf16, #tpu.memory_space<vmem>>, vector<32x32xbf16>
    %cst_44 = arith.constant dense<0.000000e+00> : vector<8x32xf32>
    %113 = tpu.matmul %111, %112, %cst_44 {dimension_numbers = #tpu.dot_dimension_numbers<[1], [0], [0], [1], [0, 0, 1, 1], [], []>} : vector<8x32xbf16>, vector<32x32xbf16>, vector<8x32xf32> -> vector<8x32xf32>
    %c0_45 = arith.constant 0 : index
    %c0_46 = arith.constant 0 : index
    %114 = vector.load %arg9[%c0_45, %c0_46] : memref<1x32xf32, #tpu.memory_space<vmem>>, vector<1x32xf32>
    %115 = vector.broadcast %114 : vector<1x32xf32> to vector<8x32xf32>
    %116 = arith.addf %113, %115 : vector<8x32xf32>
    %117 = arith.addf %116, %1 : vector<8x32xf32>
    %cst_47 = arith.constant dense<0.000000e+00> : vector<8xf32>
    %118 = vector.multi_reduction <add>, %117, %cst_47 [1] : vector<8x32xf32> to vector<8xf32>
    %119 = vector.shape_cast %118 : vector<8xf32> to vector<8x1xf32>
    %cst_48 = arith.constant 3.200000e+01 : f32
    %120 = vector.broadcast %cst_48 : f32 to vector<8x1xf32>
    %121 = arith.divf %119, %120 : vector<8x1xf32>
    %122 = vector.broadcast %121 : vector<8x1xf32> to vector<8x32xf32>
    %123 = arith.subf %117, %122 : vector<8x32xf32>
    %124 = arith.mulf %123, %123 : vector<8x32xf32>
    %cst_49 = arith.constant dense<0.000000e+00> : vector<8xf32>
    %125 = vector.multi_reduction <add>, %124, %cst_49 [1] : vector<8x32xf32> to vector<8xf32>
    %126 = vector.shape_cast %125 : vector<8xf32> to vector<8x1xf32>
    %cst_50 = arith.constant 3.200000e+01 : f32
    %127 = vector.broadcast %cst_50 : f32 to vector<8x1xf32>
    %128 = arith.divf %126, %127 : vector<8x1xf32>
    %cst_51 = arith.constant 9.99999974E-6 : f32
    %129 = vector.broadcast %cst_51 : f32 to vector<8x1xf32>
    %130 = arith.addf %128, %129 : vector<8x1xf32>
    %131 = math.rsqrt %130 : vector<8x1xf32>
    %132 = vector.broadcast %131 : vector<8x1xf32> to vector<8x32xf32>
    %133 = arith.mulf %123, %132 : vector<8x32xf32>
    %c0_52 = arith.constant 0 : index
    %c0_53 = arith.constant 0 : index
    %134 = vector.load %arg10[%c0_52, %c0_53] : memref<1x32xf32, #tpu.memory_space<vmem>>, vector<1x32xf32>
    %135 = vector.broadcast %134 : vector<1x32xf32> to vector<8x32xf32>
    %136 = arith.mulf %133, %135 : vector<8x32xf32>
    %c0_54 = arith.constant 0 : index
    %c0_55 = arith.constant 0 : index
    %137 = vector.load %arg11[%c0_54, %c0_55] : memref<1x32xf32, #tpu.memory_space<vmem>>, vector<1x32xf32>
    %138 = vector.broadcast %137 : vector<1x32xf32> to vector<8x32xf32>
    %139 = arith.addf %136, %138 : vector<8x32xf32>
    %140 = arith.truncf %139 : vector<8x32xf32> to vector<8x32xbf16>
    %c0_56 = arith.constant 0 : index
    %c0_57 = arith.constant 0 : index
    %141 = vector.load %arg12[%c0_56, %c0_57] : memref<32x128xbf16, #tpu.memory_space<vmem>>, vector<32x128xbf16>
    %cst_58 = arith.constant dense<0.000000e+00> : vector<8x128xf32>
    %142 = tpu.matmul %140, %141, %cst_58 {dimension_numbers = #tpu.dot_dimension_numbers<[1], [0], [0], [1], [0, 0, 1, 1], [], []>} : vector<8x32xbf16>, vector<32x128xbf16>, vector<8x128xf32> -> vector<8x128xf32>
    %c0_59 = arith.constant 0 : index
    %c0_60 = arith.constant 0 : index
    %143 = vector.load %arg13[%c0_59, %c0_60] : memref<1x128xf32, #tpu.memory_space<vmem>>, vector<1x128xf32>
    %144 = vector.broadcast %143 : vector<1x128xf32> to vector<8x128xf32>
    %145 = arith.addf %142, %144 : vector<8x128xf32>
    %cst_61 = arith.constant 0.000000e+00 : f32
    %146 = vector.broadcast %cst_61 : f32 to vector<8x128xf32>
    %147 = arith.maximumf %145, %146 : vector<8x128xf32>
    %148 = arith.truncf %147 : vector<8x128xf32> to vector<8x128xbf16>
    %c0_62 = arith.constant 0 : index
    %c0_63 = arith.constant 0 : index
    %149 = vector.load %arg14[%c0_62, %c0_63] : memref<128x32xbf16, #tpu.memory_space<vmem>>, vector<128x32xbf16>
    %cst_64 = arith.constant dense<0.000000e+00> : vector<8x32xf32>
    %150 = tpu.matmul %148, %149, %cst_64 {dimension_numbers = #tpu.dot_dimension_numbers<[1], [0], [0], [1], [0, 0, 1, 1], [], []>} : vector<8x128xbf16>, vector<128x32xbf16>, vector<8x32xf32> -> vector<8x32xf32>
    %c0_65 = arith.constant 0 : index
    %c0_66 = arith.constant 0 : index
    %151 = vector.load %arg15[%c0_65, %c0_66] : memref<1x32xf32, #tpu.memory_space<vmem>>, vector<1x32xf32>
    %152 = vector.broadcast %151 : vector<1x32xf32> to vector<8x32xf32>
    %153 = arith.addf %150, %152 : vector<8x32xf32>
    %154 = arith.addf %153, %139 : vector<8x32xf32>
    %cst_67 = arith.constant dense<0.000000e+00> : vector<8xf32>
    %155 = vector.multi_reduction <add>, %154, %cst_67 [1] : vector<8x32xf32> to vector<8xf32>
    %156 = vector.shape_cast %155 : vector<8xf32> to vector<8x1xf32>
    %cst_68 = arith.constant 3.200000e+01 : f32
    %157 = vector.broadcast %cst_68 : f32 to vector<8x1xf32>
    %158 = arith.divf %156, %157 : vector<8x1xf32>
    %159 = vector.broadcast %158 : vector<8x1xf32> to vector<8x32xf32>
    %160 = arith.subf %154, %159 : vector<8x32xf32>
    %161 = arith.mulf %160, %160 : vector<8x32xf32>
    %cst_69 = arith.constant dense<0.000000e+00> : vector<8xf32>
    %162 = vector.multi_reduction <add>, %161, %cst_69 [1] : vector<8x32xf32> to vector<8xf32>
    %163 = vector.shape_cast %162 : vector<8xf32> to vector<8x1xf32>
    %cst_70 = arith.constant 3.200000e+01 : f32
    %164 = vector.broadcast %cst_70 : f32 to vector<8x1xf32>
    %165 = arith.divf %163, %164 : vector<8x1xf32>
    %cst_71 = arith.constant 9.99999974E-6 : f32
    %166 = vector.broadcast %cst_71 : f32 to vector<8x1xf32>
    %167 = arith.addf %165, %166 : vector<8x1xf32>
    %168 = math.rsqrt %167 : vector<8x1xf32>
    %169 = vector.broadcast %168 : vector<8x1xf32> to vector<8x32xf32>
    %170 = arith.mulf %160, %169 : vector<8x32xf32>
    %c0_72 = arith.constant 0 : index
    %c0_73 = arith.constant 0 : index
    %171 = vector.load %arg16[%c0_72, %c0_73] : memref<1x32xf32, #tpu.memory_space<vmem>>, vector<1x32xf32>
    %172 = vector.broadcast %171 : vector<1x32xf32> to vector<8x32xf32>
    %173 = arith.mulf %170, %172 : vector<8x32xf32>
    %c0_74 = arith.constant 0 : index
    %c0_75 = arith.constant 0 : index
    %174 = vector.load %arg17[%c0_74, %c0_75] : memref<1x32xf32, #tpu.memory_space<vmem>>, vector<1x32xf32>
    %175 = vector.broadcast %174 : vector<1x32xf32> to vector<8x32xf32>
    %176 = arith.addf %173, %175 : vector<8x32xf32>
    %177 = vector.shape_cast %176 : vector<8x32xf32> to vector<1x8x32xf32>
    %c0_76 = arith.constant 0 : index
    %c0_77 = arith.constant 0 : index
    %c0_78 = arith.constant 0 : index
    %178 = vector.load %arg18[%c0_76, %c0_77, %c0_78] : memref<1x8x32xf32, #tpu.memory_space<vmem>>, vector<1x8x32xf32>
    tpu.vector_store %arg18[%c0_76, %c0_77, %c0_78], %177 {strides = array<i32>} : memref<1x8x32xf32, #tpu.memory_space<vmem>>, vector<1x8x32xf32>,
    return
  }
  func.func @transform_0(%arg0: i32) -> (i32, i32, i32) {
    %c0_i32 = arith.constant 0 : i32
    %c0_i32_0 = arith.constant 0 : i32
    %c0_i32_1 = arith.constant 0 : i32
    return %arg0, %c0_i32, %c0_i32_0 : i32, i32, i32
  }
  func.func @transform_1(%arg0: i32) -> (i32, i32, i32) {
    %c0_i32 = arith.constant 0 : i32
    %c0_i32_0 = arith.constant 0 : i32
    %c0_i32_1 = arith.constant 0 : i32
    return %arg0, %c0_i32, %c0_i32_0 : i32, i32, i32
  }
  func.func @transform_2(%arg0: i32) -> (i32, i32, i32) {
    %c0_i32 = arith.constant 0 : i32
    %c0_i32_0 = arith.constant 0 : i32
    %c0_i32_1 = arith.constant 0 : i32
    return %arg0, %c0_i32, %c0_i32_0 : i32, i32, i32
  }
  func.func @transform_3(%arg0: i32) -> (i32, i32, i32) {
    %c0_i32 = arith.constant 0 : i32
    %c0_i32_0 = arith.constant 0 : i32
    %c0_i32_1 = arith.constant 0 : i32
    return %arg0, %c0_i32, %c0_i32_0 : i32, i32, i32
  }
  func.func @transform_4(%arg0: i32) -> (i32, i32) {
    %c0_i32 = arith.constant 0 : i32
    %c0_i32_0 = arith.constant 0 : i32
    %c0_i32_1 = arith.constant 0 : i32
    return %c0_i32, %c0_i32_0 : i32, i32
  }
  func.func @transform_5(%arg0: i32) -> (i32, i32) {
    %c0_i32 = arith.constant 0 : i32
    %c0_i32_0 = arith.constant 0 : i32
    %c0_i32_1 = arith.constant 0 : i32
    return %c0_i32, %c0_i32_0 : i32, i32
  }
  func.func @transform_6(%arg0: i32) -> (i32, i32) {
    %c0_i32 = arith.constant 0 : i32
    %c0_i32_0 = arith.constant 0 : i32
    %c0_i32_1 = arith.constant 0 : i32
    return %c0_i32, %c0_i32_0 : i32, i32
  }
  func.func @transform_7(%arg0: i32) -> (i32, i32) {
    %c0_i32 = arith.constant 0 : i32
    %c0_i32_0 = arith.constant 0 : i32
    %c0_i32_1 = arith.constant 0 : i32
    return %c0_i32, %c0_i32_0 : i32, i32
  }
  func.func @transform_8(%arg0: i32) -> (i32, i32) {
    %c0_i32 = arith.constant 0 : i32
    %c0_i32_0 = arith.constant 0 : i32
    %c0_i32_1 = arith.constant 0 : i32
    return %c0_i32, %c0_i32_0 : i32, i32
  }
  func.func @transform_9(%arg0: i32) -> (i32, i32) {
    %c0_i32 = arith.constant 0 : i32
    %c0_i32_0 = arith.constant 0 : i32
    %c0_i32_1 = arith.constant 0 : i32
    return %c0_i32, %c0_i32_0 : i32, i32
  }
  func.func @transform_10(%arg0: i32) -> (i32, i32) {
    %c0_i32 = arith.constant 0 : i32
    %c0_i32_0 = arith.constant 0 : i32
    %c0_i32_1 = arith.constant 0 : i32
    return %c0_i32, %c0_i32_0 : i32, i32
  }
  func.func @transform_11(%arg0: i32) -> (i32, i32) {
    %c0_i32 = arith.constant 0 : i32
    %c0_i32_0 = arith.constant 0 : i32
    %c0_i32_1 = arith.constant 0 : i32
    return %c0_i32, %c0_i32_0 : i32, i32
  }
  func.func @transform_12(%arg0: i32) -> (i32, i32) {
    %c0_i32 = arith.constant 0 : i32
    %c0_i32_0 = arith.constant 0 : i32
    %c0_i32_1 = arith.constant 0 : i32
    return %c0_i32, %c0_i32_0 : i32, i32
  }
  func.func @transform_13(%arg0: i32) -> (i32, i32) {
    %c0_i32 = arith.constant 0 : i32
    %c0_i32_0 = arith.constant 0 : i32
    %c0_i32_1 = arith.constant 0 : i32
    return %c0_i32, %c0_i32_0 : i32, i32
  }
  func.func @transform_14(%arg0: i32) -> (i32, i32) {
    %c0_i32 = arith.constant 0 : i32
    %c0_i32_0 = arith.constant 0 : i32
    %c0_i32_1 = arith.constant 0 : i32
    return %c0_i32, %c0_i32_0 : i32, i32
  }
  func.func @transform_15(%arg0: i32) -> (i32, i32) {
    %c0_i32 = arith.constant 0 : i32
    %c0_i32_0 = arith.constant 0 : i32
    %c0_i32_1 = arith.constant 0 : i32
    return %c0_i32, %c0_i32_0 : i32, i32
  }
  func.func @transform_16(%arg0: i32) -> (i32, i32) {
    %c0_i32 = arith.constant 0 : i32
    %c0_i32_0 = arith.constant 0 : i32
    %c0_i32_1 = arith.constant 0 : i32
    return %c0_i32, %c0_i32_0 : i32, i32
  }
  func.func @transform_17(%arg0: i32) -> (i32, i32, i32) {
    %c0_i32 = arith.constant 0 : i32
    %c0_i32_0 = arith.constant 0 : i32
    %c0_i32_1 = arith.constant 0 : i32
    return %arg0, %c0_i32, %c0_i32_0 : i32, i32, i32
  }
}

</mosaic_0001>

<bundles_post_ra>
// kernel: tpu_custom_call.1
= control target key start
LH: loop header
LB: loop body
LE: loop exit
PB: predicated region body
PF: predicated region fallthrough
CT: control target
= control target key end

     0   :  { %s2871_s0 = inlined_call_operand.vmem [shape: f32[2,8,32], index: 0, kind: input, shape index: {}]   ;;  %s2872_s1 = inlined_call_operand.hbm [shape: bf16[2,8,32], index: 1, kind: input, shape index: {}]   ;;  %s2873_s2 = inlined_call_operand.hbm [shape: bf16[2,8,32], index: 2, kind: input, shape index: {}]   ;;  %s2874_s3 = inlined_call_operand.vmem [shape: f32[2,1,8], index: 3, kind: input, shape index: {}]   ;;  %s2875_s4 = inlined_call_operand.vmem [shape: bf16[32,32], index: 4, kind: input, shape index: {}]   ;;  %s2876_s5 = inlined_call_operand.vmem [shape: bf16[32,32], index: 5, kind: input, shape index: {}]   ;;  %s2877_s6 = inlined_call_operand.vmem [shape: bf16[32,32], index: 6, kind: input, shape index: {}]   ;;  %s2878_s7 = inlined_call_operand.vmem [shape: bf16[32,32], index: 7, kind: input, shape index: {}]   ;;  %s2879_s8 = inlined_call_operand.hbm [shape: f32[1,32], index: 8, kind: input, shape index: {}]   ;;  %s2880_s9 = inlined_call_operand.hbm [shape: f32[1,32], index: 9, kind: input, shape index: {}]   ;;  %s2881_s10 = inlined_call_operand.vmem [shape: f32[1,32], index: 10, kind: input, shape index: {}]   ;;  %s2882_s11 = inlined_call_operand.vmem [shape: bf16[32,128], index: 11, kind: input, shape index: {}]   ;;  %s2883_s12 = inlined_call_operand.vmem [shape: f32[1,128], index: 12, kind: input, shape index: {}]   ;;  %s2884_s13 = inlined_call_operand.vmem [shape: bf16[128,32], index: 13, kind: input, shape index: {}]   ;;  %s2885_s14 = inlined_call_operand.vmem [shape: f32[1,32], index: 14, kind: input, shape index: {}]   ;;  %s2886_s15 = inlined_call_operand.vmem [shape: f32[1,32], index: 15, kind: input, shape index: {}]   ;;  %s2887_s16 = inlined_call_operand.vmem [shape: f32[1,32], index: 16, kind: input, shape index: {}]   ;;  %s2888_s17 = inlined_call_operand.hbm [shape: f32[2,8,32], index: 17, kind: output, shape index: {}]  }
   0x1   :  { %2902 = sst [smem:[#allocation23_spill]] %s2871_s0 }
   0x2   :  { %2903 = sst [smem:[#allocation24_spill]] %s2872_s1 }
   0x3   :  { %2904 = sst [smem:[#allocation25_spill]] %s2879_s8 }
   0x4   :  { %2905 = sst [smem:[#allocation26_spill]] %s2880_s9 }
   0x5   :  { %2906 = sst [smem:[#allocation27_spill]] %s2883_s12 }
   0x6   :  { %2907 = sst [smem:[#allocation28_spill]] %s2885_s14 }
   0x7   :  { %2908 = sst [smem:[#allocation29_spill]] %s2886_s15 }
   0x8   :  { %2909 = sst [smem:[#allocation30_spill]] %s2887_s16 }
   0x9   :  { %2910 = sst [smem:[#allocation31_spill]] %s2888_s17 }
   0xa   :  { %22 = vsyncpa [#allocation4], 0 }
   0xb   :  { %24 = vsyncpa [#allocation4 + $0x1], 0 }
   0xc   :  { %25 = vsyncpa [#allocation7], 0 }
   0xd   :  { %27 = vsyncpa [#allocation7 + $0x1], 0 }
   0xe   :  { %28 = vsyncpa [#allocation10], 0 }
   0xf   :  { %29 = vsyncpa [#allocation5], 0 }
  0x10   :  { %31 = vsyncpa [#allocation5 + $0x1], 0  ;;  %s2417_s24 = smov 0   ;;  %s2419_s25 = smov 0  }
  0x11   :  { %s2421_s26 = smov 0   ;;  %s2423_s27 = smov 0  }
  0x12 LB: > { %2911 = sst [smem:[#allocation17_spill]] %s2300_s24  ;;  %s2438_s28 = sadd.s32 4294967295, %s2312_s27   ;;  %s2312_s27 = sphi %s2423_s27, %s2946_s27   ;;  %s2308_s26 = sphi %s2421_s26, %s2948_s26   ;;  %s2304_s25 = sphi %s2419_s25, %s2950_s25   ;;  %s2300_s24 = sphi %s2417_s24, %s2949_s24  }
  0x13   : > { %2912 = sst [smem:[#allocation18_spill]] %s2308_s26  ;;  %s1793_s29 = sadd.s32 4294967294, %s2312_s27  }
  0x14   : > { %p83_p0 = scmp.ne.s32.totalorder %s2304_s25, %s2300_s24  ;;  %p2893_p1 = scmp.eq.s32.totalorder %s2438_s28, 0 }
  0x15   : > { %p438_p3 = scmp.eq.s32.totalorder %s1793_s29, 1  ;;  %p1794_p5 = scmp.ge.s32.totalorder %s2312_s27, 1 }
  0x16   : > { %p2447_p4 = por %p2893_p1, %p83_p0  ;;  %p445_p7 = scmp.lt.s32.totalorder %s2312_s27, 3 }
  0x17   : > { %p2452_p6 = por %p438_p3, %p83_p0  ;;  %s2314_s19 = smov [#allocation8]  }
  0x18   : > { %s2913_s0 = scalar_select %p2447_p4, 1, 0 }
  0x19   : > { %s2914_s30 = scalar_select %p2452_p6, 1, 0 }
  0x1a   : > { %p2457_p8 = pnand %p1794_p5, %p445_p7  ;;  %s470_s1 = sshll.u32 %s2314_s19, 4  ;;  %s471_s1 = int_to_ptr.vmem [resolvable:$true] %s470_s1 }
  0x1b   : > { %2915 = sst [smem:[#allocation19_spill]] %s2914_s30  ;;  %s2315_s20 = smov [#allocation9]  }
  0x1c   : > { %s2916_s18 = scalar_select %p2457_p8, 1, 0 }
  0x1d   : > { %p2014_p10 = pneg %p2457_p8  ;;  %s481_s21 = sshll.u32 %s2315_s20, 4  ;;  %s2470_s21 = int_to_ptr.vmem [resolvable:$true] %s481_s21 }
  0x1e   : > { %s2473_s23 = sadd.s32 1, %s2312_s27   ;;  %s2919_s8 = sld [smem:[#allocation25_spill]] }
  0x1f   : > { %p2466_p11 = pnand %p2014_p10, %p2893_p1  ;;  %2918 = sst [smem:[#allocation20_spill]] %s2473_s23 }
  0x21   : > { %p2120_p13 = pneg %p2466_p11 }
  0x24   : > { %s2118_s24 = scalar_lea.hbm %s2919_s8, 16 }
  0x25   : > { %p2119_p12 = scmp.ne.s32.totalorder %s2919_s8, %s2118_s24  ;;  %p2125_p5 = scmp.lt.u32.totalorder %s2118_s24, %s2919_s8 }
  0x27   : > { %p2121_p0 = pnand %p2120_p13, %p2119_p12 }
  0x29   : > { %p2122_p3 = pneg %p2121_p0 }
  0x2b   : > { %p2127_p7 = pnand %p2125_p5, %p2122_p3 }
  0x2d   : > { %2130 = shalt.err (!%p2127_p7)
}
  0x2e   : > { %s2131_s29 = scalar_lea.vmem %s471_s1, 16  ;;  %s2138_s16 = scalar_lea.vmem %s471_s1, 32 }
  0x2f   : > { %p2132_p10 = scmp.ne.s32.totalorder %s471_s1, %s2131_s29  ;;  %p2139_p2 = scmp.lt.s32.totalorder %s471_s1, %s471_s1 }
  0x30   : > { %p2140_p6 = scmp.lt.s32.totalorder %s2138_s16, %s2131_s29 }
  0x31   : > { %p2134_p9 = pnand %p2132_p10, %p2120_p13 }
  0x32   : > { %p2141_p4 = por %p2140_p6, %p2139_p2 }
  0x33   : > { %p2135_p1 = pneg %p2134_p9 }
  0x35   : > { %p2142_p8 = pnand %p2141_p4, %p2135_p1 }
  0x37   : > { %2145 = shalt.err (!%p2142_p8)
}
  0x38   : > { %2017 = dma.hbm_to_vmem [thread:$0]  (!%p2466_p11), %s2919_s8, 16, %s471_s1, [#allocation7]  }
  0x39   : > { %s2920_s9 = sld [smem:[#allocation26_spill]] }
  0x3f   : > { %s2146_s19 = scalar_lea.hbm %s2920_s9, 16 }
  0x40   : > { %p2147_p9 = scmp.ne.s32.totalorder %s2920_s9, %s2146_s19  ;;  %p2153_p4 = scmp.lt.u32.totalorder %s2146_s19, %s2920_s9 }
  0x42   : > { %p2149_p2 = pnand %p2147_p9, %p2120_p13 }
  0x44   : > { %p2150_p1 = pneg %p2149_p2 }
  0x46   : > { %p2155_p6 = pnand %p2153_p4, %p2150_p1 }
  0x48   : > { %2158 = shalt.err (!%p2155_p6)
}
  0x49   : > { %s2159_s1 = scalar_lea.vmem %s2470_s21, 16  ;;  %s2166_s14 = scalar_lea.vmem %s2470_s21, 32 }
  0x4a   : > { %p2160_p8 = scmp.ne.s32.totalorder %s2470_s21, %s2159_s1  ;;  %p2167_p3 = scmp.lt.s32.totalorder %s2470_s21, %s2470_s21 }
  0x4b   : > { %p2168_p5 = scmp.lt.s32.totalorder %s2166_s14, %s2159_s1 }
  0x4c   : > { %p2162_p12 = pnand %p2160_p8, %p2120_p13 }
  0x4d   : > { %p2169_p7 = por %p2168_p5, %p2167_p3 }
  0x4e   : > { %p2163_p0 = pneg %p2162_p12 }
  0x50   : > { %p2170_p10 = pnand %p2169_p7, %p2163_p0 }
  0x52   : > { %2173 = shalt.err (!%p2170_p10)
}
  0x53   : > { %2020 = dma.hbm_to_vmem [thread:$0]  (!%p2466_p11), %s2920_s9, 16, %s2470_s21, [#allocation10]  }
  0x54   : > { %s2921_s24 = ssub.s32 %s2312_s27, %s2473_s23  ;;  %s70_s30 = sadd.s32 1, %s2308_s26 }
  0x55   : > { %p68_p13 = scmp.eq.s32.totalorder %s2921_s24, 0  ;;  %p77_p9 = scmp.ne.s32.totalorder %s2308_s26, %s2304_s25 }
  0x56   : > { %p78_p2 = scmp.eq.s32.totalorder %s2312_s27, 0  ;;  %p2923_p4 = scmp.eq.s32.totalorder %s2438_s28, 1 }
  0x57   : > { %s2533_s22 = scalar_select %p68_p13, %s2308_s26, %s70_s30  }
  0x58   : > { %p79_p1 = por %p78_p2, %p77_p9  ;;  %p2537_p6 = por %p2923_p4, %p77_p9 }
  0x59   : > { %2922 = sst [smem:[#allocation21_spill]] %s2533_s22  ;;  %p2034_p8 = scmp.lt.s32.totalorder %s2312_s27, 2 }
  0x5a   : > { %s2924_s19 = scalar_select %p2537_p6, 1, 0 }
  0x5b   : > { %s520_s20 = sand.u32 1, %s2308_s26   ;;  %s1799_s21 = sshll.u32 %s2312_s27, 6 }
  0x5c   : > { %2925 = sst [smem:[#allocation22_spill]] %s2924_s19  ;;  %s2543_s29 = sshll.u32 %s520_s20, 2 }
  0x5d   : > { %s2926_s14 = sld [smem:[#allocation24_spill]]  ;;  %s524_s15 = scalar_lea.vmem [#allocation3], %s2543_s29 }
  0x5e   : > { %s531_s24 = sshll.u32 %s524_s15, 4  ;;  %p2554_p11 = pnand %p2034_p8, %p79_p1  ;;  %s2552_s24 = int_to_ptr.vmem [resolvable:$true] %s531_s24 }
  0x5f   : > { %s2561_s16 = scalar_lea.hbm %s2873_s2, %s1799_s21  ;;  %s538_s1 = sand.u32 1, %s2312_s27  }
  0x60   : > { %s521_s22 = scalar_lea.sflag [#allocation4], %s520_s20  ;;  %p2176_p0 = pneg %p2554_p11 }
  0x63   : > { %s2549_s17 = scalar_lea.hbm %s2926_s14, %s1799_s21  ;;  %s2179_s19 = scalar_lea.hbm %s2926_s14, 128 }
  0x64   : > { %s2174_s26 = scalar_lea.hbm %s2549_s17, 64  ;;  %p2180_p7 = scmp.lt.u32.totalorder %s2549_s17, %s2926_s14 }
  0x65   : > { %p2175_p12 = scmp.ne.s32.totalorder %s2549_s17, %s2174_s26  ;;  %p2181_p10 = scmp.lt.u32.totalorder %s2179_s19, %s2174_s26 }
  0x66   : > { %p2183_p9 = scmp.lt.u32.totalorder %s2174_s26, %s2549_s17 }
  0x67   : > { %p2177_p3 = pnand %p2176_p0, %p2175_p12  ;;  %p2182_p13 = por %p2181_p10, %p2180_p7 }
  0x69   : > { %p2178_p5 = pneg %p2177_p3  ;;  %p2184_p2 = por %p2183_p9, %p2182_p13 }
  0x6b   : > { %p2185_p1 = pnand %p2184_p2, %p2178_p5 }
  0x6d   : > { %2188 = shalt.err (!%p2185_p1)
}
  0x6e   : > { %s2189_s9 = scalar_lea.vmem %s2552_s24, 64  ;;  %s2316_s23 = smov [#allocation3]  }
  0x6f   : > { %p2190_p4 = scmp.ne.s32.totalorder %s2552_s24, %s2189_s9  ;;  %s2194_s20 = sshll.u32 %s2316_s23, 4  ;;  %s2195_s20 = int_to_ptr.vmem [resolvable:$false] %s2194_s20 }
  0x70   : > { %s2196_s12 = scalar_lea.vmem %s2195_s20, 128  ;;  %p2197_p3 = scmp.lt.s32.totalorder %s2552_s24, %s2195_s20 }
  0x71   : > { %p2192_p8 = pnand %p2190_p4, %p2176_p0  ;;  %p2198_p7 = scmp.lt.s32.totalorder %s2196_s12, %s2189_s9 }
  0x73   : > { %p2193_p12 = pneg %p2192_p8  ;;  %p2199_p10 = por %p2198_p7, %p2197_p3 }
  0x75   : > { %p2200_p13 = pnand %p2199_p10, %p2193_p12 }
  0x77   : > { %2203 = shalt.err (!%p2200_p13)
}
  0x78   : > { %2024 = dma.hbm_to_vmem [thread:$0]  (!%p2554_p11), %s2549_s17, 64, %s2552_s24, %s521_s22  }
  0x79   : > { %s542_s26 = scalar_lea.vmem [#allocation6], %s2543_s29  ;;  %s539_s21 = scalar_lea.sflag [#allocation7], %s538_s1 }
  0x7a   : > { %s549_s19 = sshll.u32 %s542_s26, 4  ;;  %s2204_s15 = scalar_lea.hbm %s2561_s16, 64  ;;  %s550_s19 = int_to_ptr.vmem [resolvable:$true] %s549_s19 }
  0x7b   : > { %p2205_p5 = scmp.ne.s32.totalorder %s2561_s16, %s2204_s15  ;;  %s2209_s23 = scalar_lea.hbm %s2873_s2, 128 }
  0x7c   : > { %p2210_p1 = scmp.lt.u32.totalorder %s2561_s16, %s2873_s2  ;;  %p2211_p4 = scmp.lt.u32.totalorder %s2209_s23, %s2204_s15 }
  0x7d   : > { %p2207_p9 = pnand %p2205_p5, %p2176_p0  ;;  %p2213_p12 = scmp.lt.u32.totalorder %s2204_s15, %s2561_s16 }
  0x7e   : > { %p2212_p8 = por %p2211_p4, %p2210_p1 }
  0x7f   : > { %p2208_p2 = pneg %p2207_p9 }
  0x80   : > { %p2214_p3 = por %p2213_p12, %p2212_p8 }
  0x82   : > { %p2215_p7 = pnand %p2214_p3, %p2208_p2 }
  0x84   : > { %2218 = shalt.err (!%p2215_p7)
}
  0x85   : > { %s2219_s22 = scalar_lea.vmem %s550_s19, 64  ;;  %s2317_s29 = smov [#allocation6]  }
  0x86   : > { %p2220_p10 = scmp.ne.s32.totalorder %s550_s19, %s2219_s22  ;;  %s2224_s17 = sshll.u32 %s2317_s29, 4  ;;  %s2225_s17 = int_to_ptr.vmem [resolvable:$false] %s2224_s17 }
  0x87   : > { %s2226_s24 = scalar_lea.vmem %s2225_s17, 128  ;;  %p2227_p9 = scmp.lt.s32.totalorder %s550_s19, %s2225_s17 }
  0x88   : > { %p2222_p13 = pnand %p2220_p10, %p2176_p0  ;;  %p2228_p6 = scmp.lt.s32.totalorder %s2226_s24, %s2219_s22 }
  0x8a   : > { %p2223_p5 = pneg %p2222_p13  ;;  %p2229_p1 = por %p2228_p6, %p2227_p9 }
  0x8c   : > { %p2230_p4 = pnand %p2229_p1, %p2223_p5 }
  0x8e   : > { %2233 = shalt.err (!%p2230_p4)
}
  0x8f   : > { %2027 = dma.hbm_to_vmem [thread:$0]  (!%p2554_p11), %s2561_s16, 64, %s550_s19, %s539_s21  }
  0x90   : > { %p2928_p2 = scmp.ne.s32.totalorder %s2916_s18, 0 }
  0x91   : > { %s2614_s1 = sand.u32 (!%p2928_p2), 1, %s2304_s25   ;;  %p2929_p6 = scmp.ne.s32.totalorder (!%p2928_p2), %s2913_s0, 0 }
  0x92   : > { %564 = sbr.rel (%p2928_p2) target bundleno = 2558 (0x9fe), region = 88  ;;  %s1803_s26 = sshll.u32 (!%p2928_p2), %s2614_s1, 2 }
  0x93   : > { %s567_s15 = scalar_lea.sflag (!%p2928_p2), [#allocation4], %s2614_s1  ;;  %s2618_s8 = scalar_lea.vmem (!%p2928_p2), [#allocation3], %s1803_s26 }
  0x99   : > { %2279 = dma.done.wait (%p2929_p6), %s567_s15, 64  }
  0x9a   : > { %2281 = vsyncadd (%p2929_p6), %s567_s15, 4294967232  ;;  %s575_s30 = sand.u32 1, %s2438_s28   ;;  %s2625_s16 = scalar_lea.vmem [#allocation6], %s1803_s26 }
  0x9b   : > { %s576_s18 = scalar_lea.sflag [#allocation7], %s575_s30 }
  0x9c   : > { %2283 = dma.done.wait (%p2929_p6), %s576_s18, 64  }
  0x9d   : > { %2285 = vsyncadd (%p2929_p6), %s576_s18, 4294967232  ;;  %p2930_p11 = scmp.eq.s32.totalorder %s2438_s28, 0 }
  0x9f   : > { %2287 = dma.done.wait (%p2930_p11), [#allocation7], 16   ;;  %p2931_p0 = pmov %p2930_p11 }
  0xa1   : > { %2289 = vsyncadd (%p2931_p0), [#allocation7], 4294967280  ;;  %p2932_p8 = pmov %p2931_p0 }
  0xa2   : > { %p2933_p12 = pmov %p2931_p0 }
  0xa3   : > { %2291 = dma.done.wait (%p2932_p8), [#allocation10], 16  }
  0xa4   : > { %2293 = vsyncadd (%p2933_p12), [#allocation10], 4294967280  ;;  %p650_p3 = scmp.lt.s32.totalorder %s2438_s28, 1  ;;  %v2318_v0 = vmov 0.0   ;;  %vm2319_vm0 = vmmov 0   ;;  %s2934_s23 = sld [smem:[#allocation23_spill]] }
  0xa5   : > { %1892 = vmatprep.subr.bf16.mxu0 %v2318_v0  ;;  %1896 = vmatprep.mubr.msk.bf16.mxu0 %vm2319_vm0, %v2318_v0  ;;  %v2080_v1 = vld [vmem:[%s2875_s4] sm:$0xff]   ;;  %v2081_v2 = vld [vmem:[%s2875_s4 + $0x8] sm:$0xff]   ;;  %vm678_vm1 = vcmask 261120   ;;  %s2320_s18 = smov 120   ;;  %v660_v19 = vld [vmem:[%s2625_s16] sm:$0xf] }
  0xa6   : > { %s2644_s0 = scalar_select %p650_p3, %s2438_s28, 1  ;;  %1916 = vmatprep.subr.bf16.mxu1 %v2318_v0  ;;  %1918 = vmatprep.mubr.msk.bf16.mxu1 %vm2319_vm0, %v2318_v0  ;;  %v2082_v4 = vld [vmem:[%s2876_s5] sm:$0xff]   ;;  %v2083_v6 = vld [vmem:[%s2876_s5 + $0x8] sm:$0xff]   ;;  %vm886_vm2 = vcmask 1043456   ;;  %vm882_vm3 = vcmask 64512   ;;  %vm1104_vm4 = vcmask 130112  }
  0xa7   : > { %1893 = vmatpush3.bf16.msra.mxu0 %v2080_v1  ;;  %v659_v7 = vld [vmem:[%s2618_s8] sm:$0xf]  ;;  %v2084_v17 = vld [vmem:[%s2877_s6] sm:$0xff]   ;;  %s2324_s15 = smov 16   ;;  %s2325_s30 = smov 24   ;;  %vm1219_vm5 = vcmask 195712  }
  0xa8   : > { %s1808_s19 = sshll.u32 %s2644_s0, 3  ;;  %1894 = vmatprep.subr.bf16.mxu0 %v2318_v0  ;;  %v2085_v18 = vld [vmem:[%s2877_s6 + $0x8] sm:$0xff]   ;;  %s656_s22 = scalar_lea.vmem %s2874_s3, %s2644_s0  ;;  %vm1334_vm6 = vcmask 261312  }
  0xa9   : > { %v1818_v41 = vld [vmem:[%s656_s22] ss:$0 sm:$0xff]  ;;  %s2323_s0 = smov 8   ;;  %s2935_s16 = sld [smem:[#allocation27_spill]] }
  0xaa   : > { %s653_s20 = scalar_lea.vmem %s2934_s23, %s1808_s19  ;;  %s2321_s19 = smov 112  }
  0xab   : > { %v2659_v3 = vld [vmem:[%s653_s20] sm:$0xff]  ;;  %1895 = vmatpush3.bf16.msra.mxu0 %v2081_v2  ;;  %s2322_s20 = smov 104   ;;  %s1807_s29 = sshll.u32 %s2614_s1, 3 }
  0xac   : > { %v661_v5 = vpack.c.bf16 %v2659_v3, %v2659_v3  ;;  %1900 = vmatprep.subr.bf16.mxu0 %v2318_v0  ;;  %s2937_s17 = sld [smem:[#allocation22_spill]]  ;;  %s1849_s8 = sshll.u32 %s2438_s28, 7 }
  0xad   : > { %s649_s21 = scalar_lea.vmem [#allocation11], %s1807_s29  ;;  %s1647_s22 = scalar_lea.sflag [#allocation5], %s2614_s1 }
  0xae   : > { %1897 = vmatmul.mubr.msk.bf16.vlgmr.msra.gmra.mrb[0].mxu0 %vm678_vm1, %v661_v5  ;;  %s1660_s9 = sshll.u32 %s649_s21, 4  ;;  %s2326_s28 = smov [#allocation11]   ;;  %s2828_s9 = int_to_ptr.vmem [resolvable:$true] %s1660_s9 }
  0xaf   : > { %1901 = vmatpush3.bf16.msra.mxu0 %v2082_v4  ;;  %1904 = vmatprep.mubr.msk.bf16.mxu0 %vm2319_vm0, %v2318_v0  ;;  %s2238_s29 = sshll.u32 %s2326_s28, 4  ;;  %s2239_s29 = int_to_ptr.vmem [resolvable:$false] %s2238_s29 }
  0xb0   : > { %1902 = vmatprep.subr.bf16.mxu0 %v2318_v0  ;;  %s2240_s24 = scalar_lea.vmem %s2239_s29, 256  ;;  %p2241_p9 = scmp.lt.s32.totalorder %s2828_s9, %s2239_s29 }
  0xb2   : > { %p2941_p10 = scmp.ne.s32.totalorder %s2937_s17, 0 }
  0xb3   : > { %1903 = vmatpush3.bf16.msra.mxu0 %v2083_v6 }
  0xb4   : > { %1908 = vmatprep.subr.bf16.mxu0 %v2318_v0 }
  0xb6   : > { %1905 = vmatmul.mubr.msk.bf16.vlgmr.msra.gmra.mrb[4].mxu0 %vm678_vm1, %v659_v7 }
  0xb7   : > { %1912 = vmatprep.mubr.msk.bf16.mxu0 %vm2319_vm0, %v2318_v0  ;;  %1909 = vmatpush3.bf16.msra.mxu0 %v2084_v17 }
  0xb8   : > { %1910 = vmatprep.subr.bf16.mxu0 %v2318_v0 }
  0xbb   : > { %1911 = vmatpush3.bf16.msra.mxu0 %v2085_v18 }
  0xbc   : > { %1922 = vmatprep.subr.bf16.mxu0 %v2318_v0 }
  0xbe   : > { %1913 = vmatmul.mubr.msk.bf16.vlgmr.msra.gmra.mrb[8].mxu0 %vm678_vm1, %v660_v19 }
  0xbf   : > { %1924 = vmatprep.mubr.msk.bf16.mxu0 %vm2319_vm0, %v2318_v0 }
 0x181   : > { %v716_v8 = vpop.f32.mrb[0].mxu0 }
 0x182   : > { %v873_v9 = vpack.c.bf16 %v716_v8, %v716_v8  ;;  %v1898_v10 = vpop.f32.mrb[1].mxu0 }
 0x183   : > { %v719_v11 = vpop.f32.mrb[2].mxu0 }
 0x184   : > { %991 = vrot.lane.b32.xlu0 %v873_v9, %s2320_s18  ;;  %v1899_v12 = vpop.f32.mrb[3].mxu0 }
 0x188   : > { %1107 = vrot.lane.b32.xlu0 %v873_v9, %s2321_s19 }
 0x189   : > { %v775_v13 = vpop.f32.mrb[4].mxu0 }
 0x18a   : > { %840 = vxpose.xlu1.b32.start.end [1/1] (short) (narrow) %v775_v13, 32  ;;  %v1906_v14 = vpop.f32.mrb[5].mxu0 }
 0x18b   : > { %v778_v15 = vpop.f32.mrb[6].mxu0 }
 0x18c   : > { %v1907_v16 = vpop.f32.mrb[7].mxu0 }
 0x191   : > { %v834_v35 = vpop.f32.mrb[8].mxu0 }
 0x192   : > { %v1914_v36 = vpop.f32.mrb[9].mxu0  ;;  %v875_v39 = vpack.c.bf16 %v834_v35, %v834_v35 }
 0x193   : > { %v837_v37 = vpop.f32.mrb[10].mxu0 }
 0x194   : > { %v1915_v38 = vpop.f32.mrb[11].mxu0  ;;  %v944_v40 = vsel %vm886_vm2, %v875_v39, 0 }
 0x195   : > { %1923 = vmatpush3.bf16.msra.mxu0 %v944_v40 }
 0x196   : > { %1934 = vmatprep.subr.bf16.mxu0 %v2318_v0 }
 0x1b4   : > { %1222 = vrot.lane.b32.xlu1 %v873_v9, %s2322_s20 }
 0x1f6   : > { %v992_v29 = vpop.permute.xlu0 %991 }
 0x1fa   : > { %v1108_v33 = vpop.permute.xlu0 %1107 }
 0x20a   : > { %v856_v20 = vpop.trf.xlu1 }
 0x20b   : > { %v874_v21 = vpack.c.bf16 %v856_v20, %v856_v20 }
 0x20d   : > { %v888_v22 = vsel %vm886_vm2, %v874_v21, 0 }
 0x20e   : > { %1917 = vmatpush3.bf16.msra.mxu1 %v888_v22  ;;  %v857_v23 = vpop.trf.xlu1 }
 0x20f   : > { %v989_v24 = vpack.c.bf16 %v857_v23, %v857_v23  ;;  %1928 = vmatprep.subr.bf16.mxu1 %v2318_v0 }
 0x211   : > { %1919 = vmatmul.mubr.msk.bf16.vlgmr.msra.gmra.mrb[0].mxu1 %vm882_vm3, %v873_v9  ;;  %v997_v25 = vsel %vm886_vm2, %v989_v24, 0 }
 0x212   : > { %1929 = vmatpush3.bf16.msra.mxu1 %v997_v25  ;;  %1930 = vmatprep.mubr.msk.bf16.mxu1 %vm2319_vm0, %v2318_v0  ;;  %v858_v26 = vpop.trf.xlu1 }
 0x213   : > { %v1106_v27 = vpack.c.bf16 %v858_v26, %v858_v26  ;;  %1940 = vmatprep.subr.bf16.mxu1 %v2318_v0 }
 0x215   : > { %v1113_v28 = vsel %vm886_vm2, %v1106_v27, 0 }
 0x216   : > { %v859_v30 = vpop.trf.xlu1 }
 0x217   : > { %v1221_v31 = vpack.c.bf16 %v859_v30, %v859_v30 }
 0x219   : > { %1931 = vmatmul.mubr.msk.bf16.vlgmr.msra.gmra.mrb[4].mxu1 %vm882_vm3, %v992_v29  ;;  %v1228_v32 = vsel %vm886_vm2, %v1221_v31, 0 }
 0x21a   : > { %1941 = vmatpush3.bf16.msra.mxu1 %v1113_v28  ;;  %1942 = vmatprep.mubr.msk.bf16.mxu1 %vm2319_vm0, %v2318_v0 }
 0x21b   : > { %1952 = vmatprep.subr.bf16.mxu1 %v2318_v0 }
 0x221   : > { %1943 = vmatmul.mubr.msk.bf16.vlgmr.msra.gmra.mrb[8].mxu1 %vm882_vm3, %v1108_v33 }
 0x222   : > { %1953 = vmatpush3.bf16.msra.mxu1 %v1228_v32  ;;  %1954 = vmatprep.mubr.msk.bf16.mxu1 %vm2319_vm0, %v2318_v0 }
 0x223   : > { %1964 = vmatprep.subr.bf16.mxu1 %v2318_v0 }
 0x226   : > { %v1223_v34 = vpop.permute.xlu1 %1222 }
 0x229   : > { %1955 = vmatmul.mubr.msk.bf16.vlgmr.msra.gmra.mrb[12].mxu1 %vm882_vm3, %v1223_v34 }
 0x22a   : > { %1968 = vmatprep.mubr.msk.bf16.mxu1 %vm2319_vm0, %v2318_v0 }
 0x2e4   : > { %v924_v42 = vpop.f32.mrb[0].mxu1 }
 0x2e5   : > { %v925_v43 = vadd.f32 %v1818_v41, %v924_v42  ;;  %v1920_v44 = vpop.f32.mrb[1].mxu1 }
 0x2e6   : > { %v927_v45 = vpop.f32.mrb[2].mxu1 }
 0x2e7   : > { %v1921_v46 = vpop.f32.mrb[3].mxu1  ;;  %v930_v47 = vsel %vm882_vm3, %v925_v43, -inf }
 0x2e8   : > { %931 = vmax.xlane.f32.xlu0 %v930_v47 }
 0x2ec   : > { %v1033_v48 = vpop.f32.mrb[4].mxu1 }
 0x2ed   : > { %v1034_v49 = vadd.f32 %v1818_v41, %v1033_v48  ;;  %v1932_v50 = vpop.f32.mrb[5].mxu1 }
 0x2ee   : > { %v1036_v51 = vpop.f32.mrb[6].mxu1  ;;  %v2086_v50 = vld [vmem:[%s2878_s7] sm:$0xff]  }
 0x2ef   : > { %v1933_v52 = vpop.f32.mrb[7].mxu1  ;;  %v1039_v53 = vsel %vm882_vm3, %v1034_v49, -inf  ;;  %1965 = vmatpush3.bf16.msra.mxu1 %v2086_v50 }
 0x2f0   : > { %1040 = vmax.xlane.f32.xlu0 %v1039_v53  ;;  %v2087_v53 = vld [vmem:[%s2878_s7 + $0x8] sm:$0xff]   ;;  %1966 = vmatprep.subr.bf16.mxu1 %v2318_v0 }
 0x2f3   : > { %1967 = vmatpush3.bf16.msra.mxu1 %v2087_v53 }
 0x2f4   : > { %v1149_v54 = vpop.f32.mrb[8].mxu1  ;;  %1980 = vmatprep.subr.bf16.mxu1 %v2318_v0 }
 0x2f5   : > { %v1150_v55 = vadd.f32 %v1818_v41, %v1149_v54  ;;  %v1944_v56 = vpop.f32.mrb[9].mxu1 }
 0x2f6   : > { %v1152_v57 = vpop.f32.mrb[10].mxu1 }
 0x2f7   : > { %v1945_v58 = vpop.f32.mrb[11].mxu1  ;;  %v1155_v59 = vsel %vm882_vm3, %v1150_v55, -inf }
 0x2f8   : > { %1156 = vmax.xlane.f32.xlu0 %v1155_v59 }
 0x2fc   : > { %v1264_v60 = vpop.f32.mrb[12].mxu1 }
 0x2fd   : > { %v1265_v61 = vadd.f32 %v1818_v41, %v1264_v60  ;;  %v1956_v62 = vpop.f32.mrb[13].mxu1 }
 0x2fe   : > { %v1267_v63 = vpop.f32.mrb[14].mxu1 }
 0x2ff   : > { %v1957_v1 = vpop.f32.mrb[15].mxu1  ;;  %v1270_v2 = vsel %vm882_vm3, %v1265_v61, -inf }
 0x300   : > { %1271 = vmax.xlane.f32.xlu1 %v1270_v2 }
 0x30e   : > { %1050 = vrot.lane.b32.xlu0 %v875_v39, %s2320_s18 }
 0x312   : > { %1165 = vrot.lane.b32.xlu0 %v875_v39, %s2321_s19  ;;  %s2939_s19 = sld [smem:[#allocation30_spill]] }
 0x316   : > { %1280 = vrot.lane.b32.xlu0 %v875_v39, %s2322_s20 }
 0x375   : > { %v932_v4 = vpop.xlane.xlu0 %931 }
 0x376   : > { %v933_v5 = vsub.f32 %v925_v43, %v932_v4 }
 0x378   : > { %v934_v6 = vmul.f32 1.442695, %v933_v5 }
 0x37a   : > { %2098 = vpow2.f32 %v934_v6 }
 0x37d   : > { %v1041_v7 = vpop.xlane.xlu0 %1040 }
 0x37e   : > { %v1042_v8 = vsub.f32 %v1034_v49, %v1041_v7  ;;  %v1827_v7 = vld [vmem:[#allocation8] ss:$0 sm:$0xff] }
 0x380   : > { %v1043_v9 = vmul.f32 1.442695, %v1042_v8 }
 0x382   : > { %2100 = vpow2.f32 %v1043_v9 }
 0x384   : > { %v2099_v10 = vpop.eup %2098 }
 0x385   : > { %v1157_v11 = vpop.xlane.xlu0 %1156  ;;  %v939_v12 = vpack.c.bf16 %v2099_v10, %v2099_v10  ;;  %v936_v33 = vsel %vm882_vm3, %v2099_v10, 0.0 }
 0x386   : > { %v1158_v13 = vsub.f32 %v1150_v55, %v1157_v11 }
 0x387   : > { %1925 = vmatmul.mubr.msk.bf16.vlgmr.msra.gmra.mrb[12].mxu0 %vm882_vm3, %v939_v12 }
 0x388   : > { %v1159_v14 = vmul.f32 1.442695, %v1158_v13  ;;  %1936 = vmatprep.mubr.msk.bf16.mxu0 %vm2319_vm0, %v2318_v0 }
 0x389   : > { %v1051_v15 = vpop.permute.xlu0 %1050 }
 0x38a   : > { %2102 = vpow2.f32 %v1159_v14  ;;  %v1056_v16 = vsel %vm886_vm2, %v1051_v15, 0 }
 0x38b   : > { %1935 = vmatpush3.bf16.msra.mxu0 %v1056_v16 }
 0x38c   : > { %v2101_v17 = vpop.eup %2100  ;;  %1946 = vmatprep.subr.bf16.mxu0 %v2318_v0 }
 0x38d   : > { %v1272_v18 = vpop.xlane.xlu1 %1271  ;;  %v1166_v19 = vpop.permute.xlu0 %1165  ;;  %v1045_v20 = vsel %vm882_vm3, %v2101_v17, 0.0  ;;  %v1048_v21 = vpack.c.bf16 %v2101_v17, %v2101_v17 }
 0x38e   : > { %v1273_v22 = vsub.f32 %v1265_v61, %v1272_v18  ;;  %v1171_v23 = vsel %vm886_vm2, %v1166_v19, 0  ;;  %1046 = vadd.xlane.f32.xlu0 %v1045_v20  ;;  %v2088_v20 = vld [vmem:[%s2882_s11] sm:$0xff]  }
 0x38f   : > { %1937 = vmatmul.mubr.msk.bf16.vlgmr.msra.gmra.mrb[16].mxu0 %vm882_vm3, %v1048_v21  ;;  %v2089_v21 = vld [vmem:[%s2882_s11 + $0x8] sm:$0xff]  }
 0x390   : > { %v1274_v24 = vmul.f32 1.442695, %v1273_v22  ;;  %1947 = vmatpush3.bf16.msra.mxu0 %v1171_v23  ;;  %1948 = vmatprep.mubr.msk.bf16.mxu0 %vm2319_vm0, %v2318_v0  ;;  %v2091_v22 = vld [vmem:[%s2884_s13 + $0x8] sm:$0xff]   ;;  %v2092_v23 = vld [vmem:[%s2884_s13 + $0x10] sm:$0xff]  }
 0x391   : > { %1958 = vmatprep.subr.bf16.mxu0 %v2318_v0  ;;  %v1281_v26 = vpop.permute.xlu0 %1280 }
 0x392   : > { %2104 = vpow2.f32 %v1274_v24  ;;  %v1286_v29 = vsel %vm886_vm2, %v1281_v26, 0  ;;  %v2093_v24 = vld [vmem:[%s2884_s13 + $0x18] sm:$0xff]   ;;  %v2095_v26 = vld [vmem:[%s2884_s13 + $0x28] sm:$0xff]  }
 0x394   : > { %v2103_v25 = vpop.eup %2102 }
 0x395   : > { %v1161_v27 = vsel %vm882_vm3, %v2103_v25, 0.0  ;;  %v1164_v28 = vpack.c.bf16 %v2103_v25, %v2103_v25  ;;  %v2094_v25 = vld [vmem:[%s2884_s13 + $0x20] sm:$0xff]  }
 0x396   : > { %1162 = vadd.xlane.f32.xlu1 %v1161_v27 }
 0x397   : > { %1949 = vmatmul.mubr.msk.bf16.vlgmr.msra.gmra.mrb[20].mxu0 %vm882_vm3, %v1164_v28 }
 0x398   : > { %1959 = vmatpush3.bf16.msra.mxu0 %v1286_v29  ;;  %1960 = vmatprep.mubr.msk.bf16.mxu0 %vm2319_vm0, %v2318_v0 }
 0x399   : > { %1972 = vmatprep.subr.bf16.mxu0 %v2318_v0 }
 0x39c   : > { %v2105_v30 = vpop.eup %2104 }
 0x39d   : > { %v1276_v31 = vsel %vm882_vm3, %v2105_v30, 0.0  ;;  %v1279_v32 = vpack.c.bf16 %v2105_v30, %v2105_v30 }
 0x39e   : > { %1277 = vadd.xlane.f32.xlu1 %v1276_v31  ;;  %v1831_v31 = vld [vmem:[#allocation9] ss:$0 sm:$0xff] }
 0x39f   : > { %1961 = vmatmul.mubr.msk.bf16.vlgmr.msra.gmra.mrb[24].mxu0 %vm882_vm3, %v1279_v32 }
 0x3a0   : > { %1976 = vmatprep.mubr.msk.bf16.mxu0 %vm2319_vm0, %v2318_v0  ;;  %1973 = vmatpush3.bf16.msra.mxu0 %v2088_v20 }
 0x3a1   : > { %1974 = vmatprep.subr.bf16.mxu0 %v2318_v0 }
 0x3a2   : > { %937 = vadd.xlane.f32.xlu1 %v936_v33  ;;  %v1832_v33 = vld [vmem:[%s2881_s10] ss:$0 sm:$0xff] }
 0x3a4   : > { %1975 = vmatpush3.bf16.msra.mxu0 %v2089_v21 }
 0x41b   : > { %v1047_v37 = vpop.xlane.xlu0 %1046 }
 0x423   : > { %v1163_v34 = vpop.xlane.xlu1 %1162 }
 0x42b   : > { %v1278_v35 = vpop.xlane.xlu1 %1277 }
 0x42f   : > { %v938_v36 = vpop.xlane.xlu1 %937 }
 0x430   : > { %2106 = vrcp.f32 %v938_v36 }
 0x431   : > { %2108 = vrcp.f32 %v1047_v37  ;;  %v2096_v37 = vld [vmem:[%s2884_s13 + $0x30] sm:$0xff]  }
 0x432   : > { %2110 = vrcp.f32 %v1163_v34 }
 0x433   : > { %2112 = vrcp.f32 %v1278_v35 }
 0x43a   : > { %v2107_v38 = vpop.eup %2106 }
 0x43b   : > { %v2109_v44 = vpop.eup %2108 }
 0x43c   : > { %v2111_v51 = vpop.eup %2110 }
 0x43d   : > { %v2113_v58 = vpop.eup %2112 }
 0x45a   : > { %v980_v39 = vpop.f32.mrb[12].mxu0 }
 0x45b   : > { %v987_v40 = vmul.f32 %v2107_v38, %v980_v39  ;;  %v1926_v41 = vpop.f32.mrb[13].mxu0  ;;  %v2097_v38 = vld [vmem:[%s2884_s13 + $0x38] sm:$0xff]   ;;  %v1833_v39 = vld [vmem:[%s2935_s16] ss:$0 sm:$0xff]  ;;  %s2940_s16 = sld [smem:[#allocation31_spill]] }
 0x45c   : > { %v983_v42 = vpop.f32.mrb[14].mxu0 }
 0x45d   : > { %988 = vst.msk [vmem:[#allocation2] sm:$0xff] %vm882_vm3, %v987_v40  ;;  %v1927_v43 = vpop.f32.mrb[15].mxu0 }
 0x461   : > { %s2826_s12 = scalar_lea.hbm %s2940_s16, %s1849_s8 }
 0x462   : > { %v1092_v45 = vpop.f32.mrb[16].mxu0 }
 0x463   : > { %v1099_v46 = vmul.f32 %v2109_v44, %v1092_v45  ;;  %v1938_v47 = vpop.f32.mrb[17].mxu0 }
 0x464   : > { %v1095_v48 = vpop.f32.mrb[18].mxu0 }
 0x465   : > { %1101 = vrot.lane.b32.xlu1 %v1099_v46, %s2323_s0  ;;  %v1939_v49 = vpop.f32.mrb[19].mxu0  ;;  %s2936_s0 = sld [smem:[#allocation28_spill]] }
 0x46a   : > { %v1207_v52 = vpop.f32.mrb[20].mxu0 }
 0x46b   : > { %v1214_v54 = vmul.f32 %v2111_v51, %v1207_v52  ;;  %v1950_v55 = vpop.f32.mrb[21].mxu0 }
 0x46c   : > { %v1210_v56 = vpop.f32.mrb[22].mxu0 }
 0x46d   : > { %1216 = vrot.lane.b32.xlu0 %v1214_v54, %s2324_s15  ;;  %v1951_v57 = vpop.f32.mrb[23].mxu0  ;;  %s2938_s15 = sld [smem:[#allocation29_spill]] }
 0x472   : > { %v1322_v59 = vpop.f32.mrb[24].mxu0 }
 0x473   : > { %v1329_v60 = vmul.f32 %v2113_v58, %v1322_v59  ;;  %v1962_v61 = vpop.f32.mrb[25].mxu0 }
 0x474   : > { %v1325_v62 = vpop.f32.mrb[26].mxu0 }
 0x475   : > { %1331 = vrot.lane.b32.xlu1 %v1329_v60, %s2325_s30  ;;  %v1963_v63 = vpop.f32.mrb[27].mxu0 }
 0x476   : > { %v1846_v63 = vld [vmem:[%s2938_s15] ss:$0 sm:$0xff] }
 0x4d7   : > { %v1102_v1 = vpop.permute.xlu1 %1101 }
 0x4d8   : > { %1105 = vst.msk [vmem:[#allocation2] sm:$0xff] %vm1104_vm4, %v1102_v1 }
 0x4df   : > { %v1217_v2 = vpop.permute.xlu0 %1216 }
 0x4e0   : > { %1220 = vst.msk [vmem:[#allocation2] sm:$0xff] %vm1219_vm5, %v1217_v2  ;;  %v1847_v2 = vld [vmem:[%s2939_s19] ss:$0 sm:$0xff] }
 0x4e7   : > { %v1332_v4 = vpop.permute.xlu1 %1331 }
 0x4e8   : > { %1335 = vst.msk [vmem:[#allocation2] sm:$0xff] %vm1334_vm6, %v1332_v4 }
 0x4ef   : > { %v1336_v5 = vld [vmem:[#allocation2] sm:$0xff] }
 0x4f0   : > { %v1337_v6 = vpack.c.bf16 %v1336_v5, %v1336_v5 }
 0x4f2   : > { %1969 = vmatmul.mubr.msk.bf16.vlgmr.msra.gmra.mrb[16].mxu1 %vm678_vm1, %v1337_v6 }
 0x4f3   : > { %1996 = vmatprep.mubr.msk.bf16.mxu1 %vm2319_vm0, %v2318_v0 }
 0x5c5   : > { %v1398_v8 = vpop.f32.mrb[16].mxu1 }
 0x5c6   : > { %v1399_v9 = vadd.f32 %v1827_v7, %v1398_v8  ;;  %v1970_v10 = vpop.f32.mrb[17].mxu1 }
 0x5c7   : > { %v1401_v11 = vpop.f32.mrb[18].mxu1 }
 0x5c8   : > { %v1971_v12 = vpop.f32.mrb[19].mxu1  ;;  %v1404_v13 = vadd.f32 %v1399_v9, %v2659_v3  ;;  %v2090_v3 = vld [vmem:[%s2884_s13] sm:$0xff]  }
 0x5c9   : > { %1981 = vmatpush3.bf16.msra.mxu1 %v2090_v3 }
 0x5ca   : > { %v1405_v14 = vsel %vm678_vm1, %v1404_v13, 0.0  ;;  %1982 = vmatprep.subr.bf16.mxu1 %v2318_v0 }
 0x5cb   : > { %1406 = vadd.xlane.f32.xlu1 %v1405_v14 }
 0x5cd   : > { %1983 = vmatpush3.bf16.msra.mxu1 %v2091_v22 }
 0x5ce   : > { %1984 = vmatprep.subr.bf16.mxu1 %v2318_v0 }
 0x5d1   : > { %1985 = vmatpush3.bf16.msra.mxu1 %v2092_v23 }
 0x5d2   : > { %1986 = vmatprep.subr.bf16.mxu1 %v2318_v0 }
 0x5d5   : > { %1987 = vmatpush3.bf16.msra.mxu1 %v2093_v24 }
 0x5d6   : > { %1988 = vmatprep.subr.bf16.mxu1 %v2318_v0 }
 0x5d9   : > { %1989 = vmatpush3.bf16.msra.mxu1 %v2094_v25 }
 0x5da   : > { %1990 = vmatprep.subr.bf16.mxu1 %v2318_v0 }
 0x5dd   : > { %1991 = vmatpush3.bf16.msra.mxu1 %v2095_v26 }
 0x5de   : > { %1992 = vmatprep.subr.bf16.mxu1 %v2318_v0 }
 0x5e1   : > { %1993 = vmatpush3.bf16.msra.mxu1 %v2096_v37 }
 0x5e2   : > { %1994 = vmatprep.subr.bf16.mxu1 %v2318_v0  ;;  %v1837_v0 = vld [vmem:[%s2936_s0] ss:$0 sm:$0xff]  ;;  %s2234_s0 = scalar_lea.vmem %s2828_s9, 128 }
 0x5e3   : > { %p2235_p7 = scmp.ne.s32.totalorder %s2828_s9, %s2234_s0  ;;  %p2242_p1 = scmp.lt.s32.totalorder %s2240_s24, %s2234_s0 }
 0x5e5   : > { %1995 = vmatpush3.bf16.msra.mxu1 %v2097_v38  ;;  %p2236_p13 = pnand %p2235_p7, %p2941_p10  ;;  %p2243_p4 = por %p2242_p1, %p2241_p9 }
 0x5e7   : > { %p2237_p5 = pneg %p2236_p13 }
 0x5e9   : > { %p2244_p2 = pnand %p2243_p4, %p2237_p5 }
 0x658   : > { %v1407_v15 = vpop.xlane.xlu1 %1406 }
 0x659   : > { %v1409_v16 = vmul.f32 0.03125, %v1407_v15 }
 0x65b   : > { %v1410_v17 = vsub.f32 %v1404_v13, %v1409_v16 }
 0x65d   : > { %v1411_v18 = vmul.f32 %v1410_v17, %v1410_v17 }
 0x65f   : > { %v1412_v19 = vsel %vm678_vm1, %v1411_v18, 0.0 }
 0x660   : > { %1413 = vadd.xlane.f32.xlu0 %v1412_v19 }
 0x6ed   : > { %v1414_v27 = vpop.xlane.xlu0 %1413 }
 0x6ee   : > { %v1415_v28 = vmul.f32 0.03125, %v1414_v27 }
 0x6f0   : > { %v1416_v29 = vadd.f32 1e-05, %v1415_v28 }
 0x6f2   : > { %2114 = vrsqrt.f32 %v1416_v29 }
 0x6fc   : > { %v2115_v30 = vpop.eup %2114 }
 0x6fd   : > { %v1418_v32 = vmul.f32 %v2115_v30, %v1410_v17 }
 0x6ff   : > { %v1426_v34 = vmul.f32 %v1831_v31, %v1418_v32 }
 0x701   : > { %v1434_v35 = vadd.f32 %v1832_v33, %v1426_v34 }
 0x703   : > { %v1435_v36 = vpack.c.bf16 %v1434_v35, %v1434_v35 }
 0x705   : > { %1977 = vmatmul.mubr.msk.bf16.vlgmr.msra.gmra.mrb[28].mxu0 %vm678_vm1, %v1435_v36 }
 0x7d8   : > { %v1496_v40 = vpop.f32.mrb[28].mxu0 }
 0x7d9   : > { %v1497_v41 = vadd.f32 %v1833_v39, %v1496_v40  ;;  %v1978_v42 = vpop.f32.mrb[29].mxu0 }
 0x7da   : > { %v1499_v43 = vpop.f32.mrb[30].mxu0 }
 0x7db   : > { %v1502_v44 = vmax.f32 %v1497_v41, 0.0  ;;  %v1979_v45 = vpop.f32.mrb[31].mxu0 }
 0x7dd   : > { %v1503_v46 = vpack.c.bf16 %v1502_v44, %v1502_v44 }
 0x7df   : > { %1997 = vmatmul.mubr.bf16.vlgmr.msra.gmra.mrb[20].mxu1 %v1503_v46 }
 0x8b2   : > { %v1609_v47 = vpop.f32.mrb[20].mxu1 }
 0x8b3   : > { %v1610_v48 = vadd.f32 %v1837_v0, %v1609_v47  ;;  %v1998_v49 = vpop.f32.mrb[21].mxu1 }
 0x8b4   : > { %v1612_v50 = vpop.f32.mrb[22].mxu1 }
 0x8b5   : > { %v1999_v51 = vpop.f32.mrb[23].mxu1  ;;  %v1615_v52 = vadd.f32 %v1610_v48, %v1434_v35 }
 0x8b7   : > { %v1616_v53 = vsel %vm678_vm1, %v1615_v52, 0.0 }
 0x8b8   : > { %1617 = vadd.xlane.f32.xlu1 %v1616_v53 }
 0x945   : > { %v1618_v54 = vpop.xlane.xlu1 %1617 }
 0x946   : > { %v1619_v55 = vmul.f32 0.03125, %v1618_v54 }
 0x948   : > { %v1620_v56 = vsub.f32 %v1615_v52, %v1619_v55 }
 0x94a   : > { %v1621_v57 = vmul.f32 %v1620_v56, %v1620_v56 }
 0x94c   : > { %v1622_v58 = vsel %vm678_vm1, %v1621_v57, 0.0 }
 0x94d   : > { %1623 = vadd.xlane.f32.xlu1 %v1622_v58 }
 0x9da   : > { %v1624_v59 = vpop.xlane.xlu1 %1623 }
 0x9db   : > { %v1625_v60 = vmul.f32 0.03125, %v1624_v59 }
 0x9dd   : > { %v1626_v61 = vadd.f32 1e-05, %v1625_v60 }
 0x9df   : > { %2116 = vrsqrt.f32 %v1626_v61 }
 0x9e9   : > { %v2117_v62 = vpop.eup %2116 }
 0x9ea   : > { %v1628_v1 = vmul.f32 %v2117_v62, %v1620_v56 }
 0x9ec   : > { %v1636_v4 = vmul.f32 %v1846_v63, %v1628_v1 }
 0x9ee   : > { %v1644_v5 = vadd.f32 %v1847_v2, %v1636_v4 }
 0x9f0   : > { %1645 = vst.msk [vmem:[%s649_s21] sm:$0xff] %vm678_vm1, %v1644_v5 }
 0x9f1   : > { %2247 = shalt.err (!%p2244_p2)
}
 0x9f2   : > { %s2248_s1 = scalar_lea.hbm %s2826_s12, 128  ;;  %s2252_s30 = scalar_lea.hbm %s2940_s16, 256 }
 0x9f3   : > { %p2249_p6 = scmp.ne.s32.totalorder %s2826_s12, %s2248_s1  ;;  %p2253_p8 = scmp.lt.u32.totalorder %s2826_s12, %s2940_s16 }
 0x9f4   : > { %p2254_p12 = scmp.lt.u32.totalorder %s2252_s30, %s2248_s1  ;;  %p2256_p7 = scmp.lt.u32.totalorder %s2248_s1, %s2826_s12 }
 0x9f5   : > { %p2250_p11 = pnand %p2249_p6, %p2941_p10 }
 0x9f6   : > { %p2255_p3 = por %p2254_p12, %p2253_p8 }
 0x9f7   : > { %p2251_p0 = pneg %p2250_p11 }
 0x9f8   : > { %p2257_p13 = por %p2256_p7, %p2255_p3 }
 0x9fa   : > { %p2258_p5 = pnand %p2257_p13, %p2251_p0 }
 0x9fc   : > { %2261 = shalt.err (!%p2258_p5)
}
 0x9fd   : > { %2012 = dma.vmem_to_hbm [thread:$0]  (%p2941_p10), %s2828_s9, 128, %s2826_s12, %s1647_s22  }
 0x9fe PF: > { %s2942_s8 = sld [smem:[#allocation17_spill]]  ;;  %s2943_s21 = sld [smem:[#allocation19_spill]] }
 0x9ff   : > { %p2945_p1 = scmp.ge.s32.totalorder %s2312_s27, 2 }
 0xa04   : > { %s1672_s23 = sand.u32 1, %s2942_s8   ;;  %p2944_p9 = scmp.ne.s32.totalorder %s2943_s21, 0 }
 0xa05   : > { %s1673_s20 = scalar_lea.sflag [#allocation5], %s1672_s23 }
 0xa06   : > { %p2029_p4 = pnand %p2945_p1, %p2944_p9 }
 0xa08   : > { %2295 = dma.done.wait (!%p2029_p4), %s1673_s20, 128  }
 0xa09   : > { %2297 = vsyncadd (!%p2029_p4), %s1673_s20, 4294967168  ;;  %s2946_s27 = sld [smem:[#allocation20_spill]]  ;;  %s2947_s0 = sld [smem:[#allocation18_spill]] }
 0xa0a   : > { %s2948_s26 = sld [smem:[#allocation21_spill]]  ;;  %s2949_s24 = smov %s2304_s25 }
 0xa0f   : > { %p34_p2 = scmp.ge.s32.totalorder %s2946_s27, 4   ;;  %s2950_s25 = smov %s2947_s0 }
 0xa11   :  { %36 = sbr.rel (!%p34_p2) target bundleno = 18 (0x12), region = 160 }
 0xa18   :  { %1678 = vsyncpa [#allocation4], 1 }
 0xa19   :  { %1680 = vsyncpa [#allocation4 + $0x1], 1 }
 0xa1a   :  { %1681 = vsyncpa [#allocation7], 1 }
 0xa1b   :  { %1683 = vsyncpa [#allocation7 + $0x1], 1 }
 0xa1c   :  { %1684 = vsyncpa [#allocation10], 1 }
 0xa1d   :  { %1685 = vsyncpa [#allocation5], 1 }
 0xa1e   :  { %1687 = vsyncpa [#allocation5 + $0x1], 1 }

</bundles_post_ra>
